<compile_context>
chip_gen: v6e
topology: v6e:2x2x1
jax: 0.10.0
libtpu: 0.0.40
codegen_flags: <defaults>
</compile_context>

<pallas_src>
import functools

import jax
import jax.numpy as jnp
from jax.experimental import pallas as pl
from jax.experimental.pallas import tpu as pltpu


def _stacked_taps(h, dilation, ksize):
    """Causally-shifted taps of h, stacked along the channel (lane) axis.

    Column block j equals h[t - (ksize-1-j)*dilation] with zeros where the
    index is negative (== PyTorch Conv1d(padding=pad) followed by right-chomp).
    Built fully in vregs: a sublane-tile-aligned block of zero rows is
    concatenated above h and each tap is a static slice — no scratch, no
    masked stores.  Result: (T, ksize*C).
    """
    T, C = h.shape
    if ksize == 1:
        return h
    pad = (ksize - 1) * dilation
    pad8 = ((pad + 7) // 8) * 8                      # sublane-tile aligned prefix
    hp = jnp.concatenate([jnp.zeros((pad8, C), h.dtype), h], axis=0)  # (pad8+T, C)
    taps = []
    for j in range(ksize):
        start = pad8 - (ksize - 1 - j) * dilation    # static python int
        taps.append(hp[start:start + T, :])
    return jnp.concatenate(taps, axis=1)             # (T, ksize*C)


def _tcn_fused_kernel(x_ref, prelu_ref, *rest, layer_cfgs, ksize):
    """Fused forward of all TemporalBlocks for one batch element.

    x_ref     : (1, T, C_in)        VMEM
    prelu_ref : (3 * n_layers,)     SMEM   PReLU slopes [a1, a2, a3] per block
    rest      : per layer (w1, b1, w2, b2[, wd, bd]) VMEM refs, then o_ref.
                w1: (ksize*C_in, C_out), w2: (ksize*C_out, C_out) — taps
                pre-flattened into the contraction dim in the wrapper.
    """
    o_ref = rest[-1]
    wrefs = rest[:-1]

    h = x_ref[0]                                      # (T, C_in) f32
    widx = 0
    for li, (dilation, has_down) in enumerate(layer_cfgs):
        w1_ref, b1_ref, w2_ref, b2_ref = wrefs[widx:widx + 4]
        widx += 4
        if has_down:
            wd_ref, bd_ref = wrefs[widx:widx + 2]
            widx += 2

        a1 = prelu_ref[3 * li + 0]
        a2 = prelu_ref[3 * li + 1]
        a3 = prelu_ref[3 * li + 2]

        # ---- conv1 (causal, dilated) + PReLU: one MXU contraction ----------
        acc1 = jnp.dot(_stacked_taps(h, dilation, ksize), w1_ref[...],
                       preferred_element_type=jnp.float32) + b1_ref[...]
        h1 = jnp.where(acc1 > 0, acc1, a1 * acc1)     # (T, C_out)

        # ---- conv2 (causal, dilated) + PReLU: one MXU contraction ----------
        acc2 = jnp.dot(_stacked_taps(h1, dilation, ksize), w2_ref[...],
                       preferred_element_type=jnp.float32) + b2_ref[...]
        h2 = jnp.where(acc2 > 0, acc2, a2 * acc2)     # (T, C_out)

        # ---- residual (1x1 conv iff C_in != C_out) + final PReLU ------------
        if has_down:
            res = jnp.dot(h, wd_ref[...],
                          preferred_element_type=jnp.float32) + bd_ref[...]
        else:
            res = h
        s = h2 + res
        h = jnp.where(s > 0, s, a3 * s)               # becomes next layer input

    o_ref[0] = h.astype(o_ref.dtype)


def _full_block_spec(arr):
    nd = arr.ndim
    return pl.BlockSpec(arr.shape, lambda b, _nd=nd: (0,) * _nd)


def tcn_forward(x, params_all, ksize):
    """x: (B, T, input_size) f32 -> (B, T, num_channels[-1]) f32.

    Single fused pallas_call for the whole 3-stack TCN (tcn1 -> tcn2 -> tcn3).
    """
    B, T, C_in = x.shape

    layer_cfgs = []
    weights = []
    prelu_parts = []
    for params in params_all:                 # tcn1, tcn2, tcn3
        for i, p in enumerate(params):        # TemporalBlocks within a stack
            has_down = "wd" in p
            layer_cfgs.append((2 ** i, has_down))
            # Flatten (k, Cin, Cout) -> (k*Cin, Cout): tap j stacked row-block j,
            # matching the lane-axis tap stacking done inside the kernel.
            w1 = p["w1"].reshape(-1, p["w1"].shape[2])
            w2 = p["w2"].reshape(-1, p["w2"].shape[2])
            weights += [w1, p["b1"], w2, p["b2"]]
            if has_down:
                weights += [p["wd"], p["bd"]]
            prelu_parts.append(p["prelu"])
    prelu_all = jnp.concatenate(prelu_parts)  # (3 * n_layers,) SMEM scalars
    C_out = params_all[-1][-1]["w2"].shape[2]

    in_specs = [
        pl.BlockSpec((1, T, C_in), lambda b: (b, 0, 0)),
        pl.BlockSpec(memory_space=pltpu.MemorySpace.SMEM),   # PReLU slopes
    ] + [_full_block_spec(w) for w in weights]

    kernel = functools.partial(_tcn_fused_kernel,
                               layer_cfgs=tuple(layer_cfgs), ksize=ksize)

    return pl.pallas_call(
        kernel,
        out_shape=jax.ShapeDtypeStruct((B, T, C_out), jnp.float32),
        grid_spec=pltpu.PrefetchScalarGridSpec(
            num_scalar_prefetch=0,
            grid=(B,),
            in_specs=in_specs,
            out_specs=pl.BlockSpec((1, T, C_out), lambda b: (b, 0, 0)),
        ),
        compiler_params=pltpu.CompilerParams(
            dimension_semantics=("parallel",)),   # v7x: batch over the 2 TCs
    )(x, prelu_all, *weights)


# --------------------------- parameter init ---------------------------------
def init_temporal_block_params(key, c_in, c_out, ksize):
    ks = jax.random.split(key, 6)
    p = {
        # conv weights stored as (k, C_in, C_out)  (== PyTorch (C_out,C_in,k) transposed)
        "w1": 0.1 * jax.random.normal(ks[0], (ksize, c_in, c_out), jnp.float32),
        "b1": 0.1 * jax.random.normal(ks[1], (1, c_out), jnp.float32),
        "w2": 0.1 * jax.random.normal(ks[2], (ksize, c_out, c_out), jnp.float32),
        "b2": 0.1 * jax.random.normal(ks[3], (1, c_out), jnp.float32),
        # PyTorch nn.PReLU() default: single shared slope = 0.25 (relu1, relu2, relu)
        "prelu": jnp.full((3,), 0.25, jnp.float32),
    }
    if c_in != c_out:
        p["wd"] = 0.1 * jax.random.normal(ks[4], (c_in, c_out), jnp.float32)
        p["bd"] = 0.1 * jax.random.normal(ks[5], (1, c_out), jnp.float32)
    return p


def init_tcn_stack(key, num_inputs, num_channels, ksize):
    keys = jax.random.split(key, len(num_channels))
    params = []
    for i, c_out in enumerate(num_channels):
        c_in = num_inputs if i == 0 else num_channels[i - 1]
        params.append(init_temporal_block_params(keys[i], c_in, c_out, ksize))
    return params


# --------------------------- pure-JAX reference -----------------------------
def _ref_block(x, p, dilation, ksize):
    pad = (ksize - 1) * dilation

    def cconv(inp, w, b):
        B, T, _ = inp.shape
        xp = jnp.pad(inp, ((0, 0), (pad, 0), (0, 0)))
        out = jnp.zeros((B, T, w.shape[2]), jnp.float32) + b
        for j in range(ksize):
            out = out + jnp.einsum("btc,cd->btd",
                                   xp[:, j * dilation:j * dilation + T, :], w[j])
        return out

    def prelu(v, a):
        return jnp.where(v > 0, v, a * v)

    h = prelu(cconv(x, p["w1"], p["b1"]), p["prelu"][0])
    h = prelu(cconv(h, p["w2"], p["b2"]), p["prelu"][1])
    res = x if "wd" not in p else jnp.einsum("btc,cd->btd", x, p["wd"]) + p["bd"]
    return prelu(h + res, p["prelu"][2])


if __name__ == "__main__":
    key = jax.random.PRNGKey(0)
    B, T = 2, 16
    input_size = 8
    # NOTE: the PyTorch TCN chains tcn1->tcn2->tcn3 all built with `input_size`
    # inputs, so it implicitly requires num_channels[-1] == input_size.
    num_channels = (16, 8)
    ksize = 2

    kx, k1, k2, k3 = jax.random.split(key, 4)
    x = jax.random.normal(kx, (B, T, input_size), jnp.float32)

    params_all = [init_tcn_stack(k, input_size, num_channels, ksize)
                  for k in (k1, k2, k3)]

    out = tcn_forward(x, params_all, ksize)
    out = jax.block_until_ready(out)
    assert out.shape == (B, T, num_channels[-1])

    # correctness check vs. pure-JAX reference
    ref = x
    for params in params_all:
        for i, p in enumerate(params):
            ref = _ref_block(ref, p, 2 ** i, ksize)
    assert jnp.allclose(out, ref, atol=1e-4, rtol=1e-4), "mismatch vs reference"

    print("KERNEL_OK")
</pallas_src>

<mosaic_0001>
module attributes {stable_mosaic.version = 11 : i64} {
  func.func @_tcn_fused_kernel(%arg0: i32, %arg1: memref<1x16x8xf32, #tpu.memory_space<vmem>>, %arg2: memref<18xf32, #tpu.memory_space<smem>>, %arg3: memref<16x16xf32, #tpu.memory_space<vmem>>, %arg4: memref<1x16xf32, #tpu.memory_space<vmem>>, %arg5: memref<32x16xf32, #tpu.memory_space<vmem>>, %arg6: memref<1x16xf32, #tpu.memory_space<vmem>>, %arg7: memref<8x16xf32, #tpu.memory_space<vmem>>, %arg8: memref<1x16xf32, #tpu.memory_space<vmem>>, %arg9: memref<32x8xf32, #tpu.memory_space<vmem>>, %arg10: memref<1x8xf32, #tpu.memory_space<vmem>>, %arg11: memref<16x8xf32, #tpu.memory_space<vmem>>, %arg12: memref<1x8xf32, #tpu.memory_space<vmem>>, %arg13: memref<16x8xf32, #tpu.memory_space<vmem>>, %arg14: memref<1x8xf32, #tpu.memory_space<vmem>>, %arg15: memref<16x16xf32, #tpu.memory_space<vmem>>, %arg16: memref<1x16xf32, #tpu.memory_space<vmem>>, %arg17: memref<32x16xf32, #tpu.memory_space<vmem>>, %arg18: memref<1x16xf32, #tpu.memory_space<vmem>>, %arg19: memref<8x16xf32, #tpu.memory_space<vmem>>, %arg20: memref<1x16xf32, #tpu.memory_space<vmem>>, %arg21: memref<32x8xf32, #tpu.memory_space<vmem>>, %arg22: memref<1x8xf32, #tpu.memory_space<vmem>>, %arg23: memref<16x8xf32, #tpu.memory_space<vmem>>, %arg24: memref<1x8xf32, #tpu.memory_space<vmem>>, %arg25: memref<16x8xf32, #tpu.memory_space<vmem>>, %arg26: memref<1x8xf32, #tpu.memory_space<vmem>>, %arg27: memref<16x16xf32, #tpu.memory_space<vmem>>, %arg28: memref<1x16xf32, #tpu.memory_space<vmem>>, %arg29: memref<32x16xf32, #tpu.memory_space<vmem>>, %arg30: memref<1x16xf32, #tpu.memory_space<vmem>>, %arg31: memref<8x16xf32, #tpu.memory_space<vmem>>, %arg32: memref<1x16xf32, #tpu.memory_space<vmem>>, %arg33: memref<32x8xf32, #tpu.memory_space<vmem>>, %arg34: memref<1x8xf32, #tpu.memory_space<vmem>>, %arg35: memref<16x8xf32, #tpu.memory_space<vmem>>, %arg36: memref<1x8xf32, #tpu.memory_space<vmem>>, %arg37: memref<16x8xf32, #tpu.memory_space<vmem>>, %arg38: memref<1x8xf32, #tpu.memory_space<vmem>>, %arg39: memref<1x16x8xf32, #tpu.memory_space<vmem>>) attributes {dimension_semantics = [#tpu.dimension_semantics<parallel>], iteration_bounds = array<i64: 2>, scalar_prefetch = 0 : i64, scratch_operands = 0 : i64, tpu.core_type = #tpu.core_type<tc>, window_params = [{transform_indices = @transform_0, window_bounds = array<i64: 1, 16, 8>}, {transform_indices = @transform_1, window_bounds = array<i64: 18>}, {pipeline_mode = #tpu.pipeline_mode<synchronous>, transform_indices = @transform_2, window_bounds = array<i64: 16, 16>}, {pipeline_mode = #tpu.pipeline_mode<synchronous>, transform_indices = @transform_3, window_bounds = array<i64: 1, 16>}, {pipeline_mode = #tpu.pipeline_mode<synchronous>, transform_indices = @transform_4, window_bounds = array<i64: 32, 16>}, {pipeline_mode = #tpu.pipeline_mode<synchronous>, transform_indices = @transform_5, window_bounds = array<i64: 1, 16>}, {pipeline_mode = #tpu.pipeline_mode<synchronous>, transform_indices = @transform_6, window_bounds = array<i64: 8, 16>}, {pipeline_mode = #tpu.pipeline_mode<synchronous>, transform_indices = @transform_7, window_bounds = array<i64: 1, 16>}, {pipeline_mode = #tpu.pipeline_mode<synchronous>, transform_indices = @transform_8, window_bounds = array<i64: 32, 8>}, {pipeline_mode = #tpu.pipeline_mode<synchronous>, transform_indices = @transform_9, window_bounds = array<i64: 1, 8>}, {pipeline_mode = #tpu.pipeline_mode<synchronous>, transform_indices = @transform_10, window_bounds = array<i64: 16, 8>}, {pipeline_mode = #tpu.pipeline_mode<synchronous>, transform_indices = @transform_11, window_bounds = array<i64: 1, 8>}, {pipeline_mode = #tpu.pipeline_mode<synchronous>, transform_indices = @transform_12, window_bounds = array<i64: 16, 8>}, {pipeline_mode = #tpu.pipeline_mode<synchronous>, transform_indices = @transform_13, window_bounds = array<i64: 1, 8>}, {pipeline_mode = #tpu.pipeline_mode<synchronous>, transform_indices = @transform_14, window_bounds = array<i64: 16, 16>}, {pipeline_mode = #tpu.pipeline_mode<synchronous>, transform_indices = @transform_15, window_bounds = array<i64: 1, 16>}, {pipeline_mode = #tpu.pipeline_mode<synchronous>, transform_indices = @transform_16, window_bounds = array<i64: 32, 16>}, {pipeline_mode = #tpu.pipeline_mode<synchronous>, transform_indices = @transform_17, window_bounds = array<i64: 1, 16>}, {pipeline_mode = #tpu.pipeline_mode<synchronous>, transform_indices = @transform_18, window_bounds = array<i64: 8, 16>}, {pipeline_mode = #tpu.pipeline_mode<synchronous>, transform_indices = @transform_19, window_bounds = array<i64: 1, 16>}, {pipeline_mode = #tpu.pipeline_mode<synchronous>, transform_indices = @transform_20, window_bounds = array<i64: 32, 8>}, {pipeline_mode = #tpu.pipeline_mode<synchronous>, transform_indices = @transform_21, window_bounds = array<i64: 1, 8>}, {pipeline_mode = #tpu.pipeline_mode<synchronous>, transform_indices = @transform_22, window_bounds = array<i64: 16, 8>}, {pipeline_mode = #tpu.pipeline_mode<synchronous>, transform_indices = @transform_23, window_bounds = array<i64: 1, 8>}, {pipeline_mode = #tpu.pipeline_mode<synchronous>, transform_indices = @transform_24, window_bounds = array<i64: 16, 8>}, {pipeline_mode = #tpu.pipeline_mode<synchronous>, transform_indices = @transform_25, window_bounds = array<i64: 1, 8>}, {pipeline_mode = #tpu.pipeline_mode<synchronous>, transform_indices = @transform_26, window_bounds = array<i64: 16, 16>}, {pipeline_mode = #tpu.pipeline_mode<synchronous>, transform_indices = @transform_27, window_bounds = array<i64: 1, 16>}, {pipeline_mode = #tpu.pipeline_mode<synchronous>, transform_indices = @transform_28, window_bounds = array<i64: 32, 16>}, {pipeline_mode = #tpu.pipeline_mode<synchronous>, transform_indices = @transform_29, window_bounds = array<i64: 1, 16>}, {pipeline_mode = #tpu.pipeline_mode<synchronous>, transform_indices = @transform_30, window_bounds = array<i64: 8, 16>}, {pipeline_mode = #tpu.pipeline_mode<synchronous>, transform_indices = @transform_31, window_bounds = array<i64: 1, 16>}, {pipeline_mode = #tpu.pipeline_mode<synchronous>, transform_indices = @transform_32, window_bounds = array<i64: 32, 8>}, {pipeline_mode = #tpu.pipeline_mode<synchronous>, transform_indices = @transform_33, window_bounds = array<i64: 1, 8>}, {pipeline_mode = #tpu.pipeline_mode<synchronous>, transform_indices = @transform_34, window_bounds = array<i64: 16, 8>}, {pipeline_mode = #tpu.pipeline_mode<synchronous>, transform_indices = @transform_35, window_bounds = array<i64: 1, 8>}, {pipeline_mode = #tpu.pipeline_mode<synchronous>, transform_indices = @transform_36, window_bounds = array<i64: 16, 8>}, {pipeline_mode = #tpu.pipeline_mode<synchronous>, transform_indices = @transform_37, window_bounds = array<i64: 1, 8>}, {transform_indices = @transform_38, window_bounds = array<i64: 1, 16, 8>}]} {
    %c0 = arith.constant 0 : index
    %c0_0 = arith.constant 0 : index
    %c0_1 = arith.constant 0 : index
    %0 = vector.load %arg1[%c0, %c0_0, %c0_1] : memref<1x16x8xf32, #tpu.memory_space<vmem>>, vector<1x16x8xf32>
    %1 = vector.shape_cast %0 : vector<1x16x8xf32> to vector<16x8xf32>
    %c0_2 = arith.constant 0 : index
    %2 = memref.load %arg2[%c0_2] : memref<18xf32, #tpu.memory_space<smem>>
    %c1 = arith.constant 1 : index
    %3 = memref.load %arg2[%c1] : memref<18xf32, #tpu.memory_space<smem>>
    %c2 = arith.constant 2 : index
    %4 = memref.load %arg2[%c2] : memref<18xf32, #tpu.memory_space<smem>>
    %cst = arith.constant 0.000000e+00 : f32
    %5 = vector.broadcast %cst : f32 to vector<8x8xf32>
    %6 = tpu.concatenate %5, %1 in 0 : vector<8x8xf32>, vector<16x8xf32> -> vector<24x8xf32>
    %7 = vector.extract_strided_slice %6 {offsets = [7, 0], sizes = [16, 8], strides = [1, 1]} : vector<24x8xf32> to vector<16x8xf32>
    %8 = vector.extract_strided_slice %6 {offsets = [8, 0], sizes = [16, 8], strides = [1, 1]} : vector<24x8xf32> to vector<16x8xf32>
    %9 = tpu.concatenate %7, %8 in 1 : vector<16x8xf32>, vector<16x8xf32> -> vector<16x16xf32>
    %c0_3 = arith.constant 0 : index
    %c0_4 = arith.constant 0 : index
    %10 = vector.load %arg3[%c0_3, %c0_4] : memref<16x16xf32, #tpu.memory_space<vmem>>, vector<16x16xf32>
    %cst_5 = arith.constant dense<0.000000e+00> : vector<16x16xf32>
    %11 = tpu.matmul %9, %10, %cst_5 {dimension_numbers = #tpu.dot_dimension_numbers<[1], [0], [0], [1], [0, 0, 1, 1], [], []>} : vector<16x16xf32>, vector<16x16xf32>, vector<16x16xf32> -> vector<16x16xf32>
    %c0_6 = arith.constant 0 : index
    %c0_7 = arith.constant 0 : index
    %12 = vector.load %arg4[%c0_6, %c0_7] : memref<1x16xf32, #tpu.memory_space<vmem>>, vector<1x16xf32>
    %13 = vector.broadcast %12 : vector<1x16xf32> to vector<16x16xf32>
    %14 = arith.addf %11, %13 : vector<16x16xf32>
    %cst_8 = arith.constant 0.000000e+00 : f32
    %15 = vector.broadcast %cst_8 : f32 to vector<16x16xf32>
    %16 = arith.cmpf ogt, %14, %15 : vector<16x16xf32>
    %17 = vector.broadcast %2 : f32 to vector<16x16xf32>
    %18 = arith.mulf %17, %14 : vector<16x16xf32>
    %19 = arith.select %16, %14, %18 : vector<16x16xi1>, vector<16x16xf32>
    %cst_9 = arith.constant 0.000000e+00 : f32
    %20 = vector.broadcast %cst_9 : f32 to vector<8x16xf32>
    %21 = tpu.concatenate %20, %19 in 0 : vector<8x16xf32>, vector<16x16xf32> -> vector<24x16xf32>
    %22 = vector.extract_strided_slice %21 {offsets = [7, 0], sizes = [16, 16], strides = [1, 1]} : vector<24x16xf32> to vector<16x16xf32>
    %23 = vector.extract_strided_slice %21 {offsets = [8, 0], sizes = [16, 16], strides = [1, 1]} : vector<24x16xf32> to vector<16x16xf32>
    %24 = tpu.concatenate %22, %23 in 1 : vector<16x16xf32>, vector<16x16xf32> -> vector<16x32xf32>
    %c0_10 = arith.constant 0 : index
    %c0_11 = arith.constant 0 : index
    %25 = vector.load %arg5[%c0_10, %c0_11] : memref<32x16xf32, #tpu.memory_space<vmem>>, vector<32x16xf32>
    %cst_12 = arith.constant dense<0.000000e+00> : vector<16x16xf32>
    %26 = tpu.matmul %24, %25, %cst_12 {dimension_numbers = #tpu.dot_dimension_numbers<[1], [0], [0], [1], [0, 0, 1, 1], [], []>} : vector<16x32xf32>, vector<32x16xf32>, vector<16x16xf32> -> vector<16x16xf32>
    %c0_13 = arith.constant 0 : index
    %c0_14 = arith.constant 0 : index
    %27 = vector.load %arg6[%c0_13, %c0_14] : memref<1x16xf32, #tpu.memory_space<vmem>>, vector<1x16xf32>
    %28 = vector.broadcast %27 : vector<1x16xf32> to vector<16x16xf32>
    %29 = arith.addf %26, %28 : vector<16x16xf32>
    %cst_15 = arith.constant 0.000000e+00 : f32
    %30 = vector.broadcast %cst_15 : f32 to vector<16x16xf32>
    %31 = arith.cmpf ogt, %29, %30 : vector<16x16xf32>
    %32 = vector.broadcast %3 : f32 to vector<16x16xf32>
    %33 = arith.mulf %32, %29 : vector<16x16xf32>
    %34 = arith.select %31, %29, %33 : vector<16x16xi1>, vector<16x16xf32>
    %c0_16 = arith.constant 0 : index
    %c0_17 = arith.constant 0 : index
    %35 = vector.load %arg7[%c0_16, %c0_17] : memref<8x16xf32, #tpu.memory_space<vmem>>, vector<8x16xf32>
    %cst_18 = arith.constant dense<0.000000e+00> : vector<16x16xf32>
    %36 = tpu.matmul %1, %35, %cst_18 {dimension_numbers = #tpu.dot_dimension_numbers<[1], [0], [0], [1], [0, 0, 1, 1], [], []>} : vector<16x8xf32>, vector<8x16xf32>, vector<16x16xf32> -> vector<16x16xf32>
    %c0_19 = arith.constant 0 : index
    %c0_20 = arith.constant 0 : index
    %37 = vector.load %arg8[%c0_19, %c0_20] : memref<1x16xf32, #tpu.memory_space<vmem>>, vector<1x16xf32>
    %38 = vector.broadcast %37 : vector<1x16xf32> to vector<16x16xf32>
    %39 = arith.addf %36, %38 : vector<16x16xf32>
    %40 = arith.addf %34, %39 : vector<16x16xf32>
    %cst_21 = arith.constant 0.000000e+00 : f32
    %41 = vector.broadcast %cst_21 : f32 to vector<16x16xf32>
    %42 = arith.cmpf ogt, %40, %41 : vector<16x16xf32>
    %43 = vector.broadcast %4 : f32 to vector<16x16xf32>
    %44 = arith.mulf %43, %40 : vector<16x16xf32>
    %45 = arith.select %42, %40, %44 : vector<16x16xi1>, vector<16x16xf32>
    %c3 = arith.constant 3 : index
    %46 = memref.load %arg2[%c3] : memref<18xf32, #tpu.memory_space<smem>>
    %c4 = arith.constant 4 : index
    %47 = memref.load %arg2[%c4] : memref<18xf32, #tpu.memory_space<smem>>
    %c5 = arith.constant 5 : index
    %48 = memref.load %arg2[%c5] : memref<18xf32, #tpu.memory_space<smem>>
    %cst_22 = arith.constant 0.000000e+00 : f32
    %49 = vector.broadcast %cst_22 : f32 to vector<8x16xf32>
    %50 = tpu.concatenate %49, %45 in 0 : vector<8x16xf32>, vector<16x16xf32> -> vector<24x16xf32>
    %51 = vector.extract_strided_slice %50 {offsets = [6, 0], sizes = [16, 16], strides = [1, 1]} : vector<24x16xf32> to vector<16x16xf32>
    %52 = vector.extract_strided_slice %50 {offsets = [8, 0], sizes = [16, 16], strides = [1, 1]} : vector<24x16xf32> to vector<16x16xf32>
    %53 = tpu.concatenate %51, %52 in 1 : vector<16x16xf32>, vector<16x16xf32> -> vector<16x32xf32>
    %c0_23 = arith.constant 0 : index
    %c0_24 = arith.constant 0 : index
    %54 = vector.load %arg9[%c0_23, %c0_24] : memref<32x8xf32, #tpu.memory_space<vmem>>, vector<32x8xf32>
    %cst_25 = arith.constant dense<0.000000e+00> : vector<16x8xf32>
    %55 = tpu.matmul %53, %54, %cst_25 {dimension_numbers = #tpu.dot_dimension_numbers<[1], [0], [0], [1], [0, 0, 1, 1], [], []>} : vector<16x32xf32>, vector<32x8xf32>, vector<16x8xf32> -> vector<16x8xf32>
    %c0_26 = arith.constant 0 : index
    %c0_27 = arith.constant 0 : index
    %56 = vector.load %arg10[%c0_26, %c0_27] : memref<1x8xf32, #tpu.memory_space<vmem>>, vector<1x8xf32>
    %57 = vector.broadcast %56 : vector<1x8xf32> to vector<16x8xf32>
    %58 = arith.addf %55, %57 : vector<16x8xf32>
    %cst_28 = arith.constant 0.000000e+00 : f32
    %59 = vector.broadcast %cst_28 : f32 to vector<16x8xf32>
    %60 = arith.cmpf ogt, %58, %59 : vector<16x8xf32>
    %61 = vector.broadcast %46 : f32 to vector<16x8xf32>
    %62 = arith.mulf %61, %58 : vector<16x8xf32>
    %63 = arith.select %60, %58, %62 : vector<16x8xi1>, vector<16x8xf32>
    %cst_29 = arith.constant 0.000000e+00 : f32
    %64 = vector.broadcast %cst_29 : f32 to vector<8x8xf32>
    %65 = tpu.concatenate %64, %63 in 0 : vector<8x8xf32>, vector<16x8xf32> -> vector<24x8xf32>
    %66 = vector.extract_strided_slice %65 {offsets = [6, 0], sizes = [16, 8], strides = [1, 1]} : vector<24x8xf32> to vector<16x8xf32>
    %67 = vector.extract_strided_slice %65 {offsets = [8, 0], sizes = [16, 8], strides = [1, 1]} : vector<24x8xf32> to vector<16x8xf32>
    %68 = tpu.concatenate %66, %67 in 1 : vector<16x8xf32>, vector<16x8xf32> -> vector<16x16xf32>
    %c0_30 = arith.constant 0 : index
    %c0_31 = arith.constant 0 : index
    %69 = vector.load %arg11[%c0_30, %c0_31] : memref<16x8xf32, #tpu.memory_space<vmem>>, vector<16x8xf32>
    %cst_32 = arith.constant dense<0.000000e+00> : vector<16x8xf32>
    %70 = tpu.matmul %68, %69, %cst_32 {dimension_numbers = #tpu.dot_dimension_numbers<[1], [0], [0], [1], [0, 0, 1, 1], [], []>} : vector<16x16xf32>, vector<16x8xf32>, vector<16x8xf32> -> vector<16x8xf32>
    %c0_33 = arith.constant 0 : index
    %c0_34 = arith.constant 0 : index
    %71 = vector.load %arg12[%c0_33, %c0_34] : memref<1x8xf32, #tpu.memory_space<vmem>>, vector<1x8xf32>
    %72 = vector.broadcast %71 : vector<1x8xf32> to vector<16x8xf32>
    %73 = arith.addf %70, %72 : vector<16x8xf32>
    %cst_35 = arith.constant 0.000000e+00 : f32
    %74 = vector.broadcast %cst_35 : f32 to vector<16x8xf32>
    %75 = arith.cmpf ogt, %73, %74 : vector<16x8xf32>
    %76 = vector.broadcast %47 : f32 to vector<16x8xf32>
    %77 = arith.mulf %76, %73 : vector<16x8xf32>
    %78 = arith.select %75, %73, %77 : vector<16x8xi1>, vector<16x8xf32>
    %c0_36 = arith.constant 0 : index
    %c0_37 = arith.constant 0 : index
    %79 = vector.load %arg13[%c0_36, %c0_37] : memref<16x8xf32, #tpu.memory_space<vmem>>, vector<16x8xf32>
    %cst_38 = arith.constant dense<0.000000e+00> : vector<16x8xf32>
    %80 = tpu.matmul %45, %79, %cst_38 {dimension_numbers = #tpu.dot_dimension_numbers<[1], [0], [0], [1], [0, 0, 1, 1], [], []>} : vector<16x16xf32>, vector<16x8xf32>, vector<16x8xf32> -> vector<16x8xf32>
    %c0_39 = arith.constant 0 : index
    %c0_40 = arith.constant 0 : index
    %81 = vector.load %arg14[%c0_39, %c0_40] : memref<1x8xf32, #tpu.memory_space<vmem>>, vector<1x8xf32>
    %82 = vector.broadcast %81 : vector<1x8xf32> to vector<16x8xf32>
    %83 = arith.addf %80, %82 : vector<16x8xf32>
    %84 = arith.addf %78, %83 : vector<16x8xf32>
    %cst_41 = arith.constant 0.000000e+00 : f32
    %85 = vector.broadcast %cst_41 : f32 to vector<16x8xf32>
    %86 = arith.cmpf ogt, %84, %85 : vector<16x8xf32>
    %87 = vector.broadcast %48 : f32 to vector<16x8xf32>
    %88 = arith.mulf %87, %84 : vector<16x8xf32>
    %89 = arith.select %86, %84, %88 : vector<16x8xi1>, vector<16x8xf32>
    %c6 = arith.constant 6 : index
    %90 = memref.load %arg2[%c6] : memref<18xf32, #tpu.memory_space<smem>>
    %c7 = arith.constant 7 : index
    %91 = memref.load %arg2[%c7] : memref<18xf32, #tpu.memory_space<smem>>
    %c8 = arith.constant 8 : index
    %92 = memref.load %arg2[%c8] : memref<18xf32, #tpu.memory_space<smem>>
    %cst_42 = arith.constant 0.000000e+00 : f32
    %93 = vector.broadcast %cst_42 : f32 to vector<8x8xf32>
    %94 = tpu.concatenate %93, %89 in 0 : vector<8x8xf32>, vector<16x8xf32> -> vector<24x8xf32>
    %95 = vector.extract_strided_slice %94 {offsets = [7, 0], sizes = [16, 8], strides = [1, 1]} : vector<24x8xf32> to vector<16x8xf32>
    %96 = vector.extract_strided_slice %94 {offsets = [8, 0], sizes = [16, 8], strides = [1, 1]} : vector<24x8xf32> to vector<16x8xf32>
    %97 = tpu.concatenate %95, %96 in 1 : vector<16x8xf32>, vector<16x8xf32> -> vector<16x16xf32>
    %c0_43 = arith.constant 0 : index
    %c0_44 = arith.constant 0 : index
    %98 = vector.load %arg15[%c0_43, %c0_44] : memref<16x16xf32, #tpu.memory_space<vmem>>, vector<16x16xf32>
    %cst_45 = arith.constant dense<0.000000e+00> : vector<16x16xf32>
    %99 = tpu.matmul %97, %98, %cst_45 {dimension_numbers = #tpu.dot_dimension_numbers<[1], [0], [0], [1], [0, 0, 1, 1], [], []>} : vector<16x16xf32>, vector<16x16xf32>, vector<16x16xf32> -> vector<16x16xf32>
    %c0_46 = arith.constant 0 : index
    %c0_47 = arith.constant 0 : index
    %100 = vector.load %arg16[%c0_46, %c0_47] : memref<1x16xf32, #tpu.memory_space<vmem>>, vector<1x16xf32>
    %101 = vector.broadcast %100 : vector<1x16xf32> to vector<16x16xf32>
    %102 = arith.addf %99, %101 : vector<16x16xf32>
    %cst_48 = arith.constant 0.000000e+00 : f32
    %103 = vector.broadcast %cst_48 : f32 to vector<16x16xf32>
    %104 = arith.cmpf ogt, %102, %103 : vector<16x16xf32>
    %105 = vector.broadcast %90 : f32 to vector<16x16xf32>
    %106 = arith.mulf %105, %102 : vector<16x16xf32>
    %107 = arith.select %104, %102, %106 : vector<16x16xi1>, vector<16x16xf32>
    %cst_49 = arith.constant 0.000000e+00 : f32
    %108 = vector.broadcast %cst_49 : f32 to vector<8x16xf32>
    %109 = tpu.concatenate %108, %107 in 0 : vector<8x16xf32>, vector<16x16xf32> -> vector<24x16xf32>
    %110 = vector.extract_strided_slice %109 {offsets = [7, 0], sizes = [16, 16], strides = [1, 1]} : vector<24x16xf32> to vector<16x16xf32>
    %111 = vector.extract_strided_slice %109 {offsets = [8, 0], sizes = [16, 16], strides = [1, 1]} : vector<24x16xf32> to vector<16x16xf32>
    %112 = tpu.concatenate %110, %111 in 1 : vector<16x16xf32>, vector<16x16xf32> -> vector<16x32xf32>
    %c0_50 = arith.constant 0 : index
    %c0_51 = arith.constant 0 : index
    %113 = vector.load %arg17[%c0_50, %c0_51] : memref<32x16xf32, #tpu.memory_space<vmem>>, vector<32x16xf32>
    %cst_52 = arith.constant dense<0.000000e+00> : vector<16x16xf32>
    %114 = tpu.matmul %112, %113, %cst_52 {dimension_numbers = #tpu.dot_dimension_numbers<[1], [0], [0], [1], [0, 0, 1, 1], [], []>} : vector<16x32xf32>, vector<32x16xf32>, vector<16x16xf32> -> vector<16x16xf32>
    %c0_53 = arith.constant 0 : index
    %c0_54 = arith.constant 0 : index
    %115 = vector.load %arg18[%c0_53, %c0_54] : memref<1x16xf32, #tpu.memory_space<vmem>>, vector<1x16xf32>
    %116 = vector.broadcast %115 : vector<1x16xf32> to vector<16x16xf32>
    %117 = arith.addf %114, %116 : vector<16x16xf32>
    %cst_55 = arith.constant 0.000000e+00 : f32
    %118 = vector.broadcast %cst_55 : f32 to vector<16x16xf32>
    %119 = arith.cmpf ogt, %117, %118 : vector<16x16xf32>
    %120 = vector.broadcast %91 : f32 to vector<16x16xf32>
    %121 = arith.mulf %120, %117 : vector<16x16xf32>
    %122 = arith.select %119, %117, %121 : vector<16x16xi1>, vector<16x16xf32>
    %c0_56 = arith.constant 0 : index
    %c0_57 = arith.constant 0 : index
    %123 = vector.load %arg19[%c0_56, %c0_57] : memref<8x16xf32, #tpu.memory_space<vmem>>, vector<8x16xf32>
    %cst_58 = arith.constant dense<0.000000e+00> : vector<16x16xf32>
    %124 = tpu.matmul %89, %123, %cst_58 {dimension_numbers = #tpu.dot_dimension_numbers<[1], [0], [0], [1], [0, 0, 1, 1], [], []>} : vector<16x8xf32>, vector<8x16xf32>, vector<16x16xf32> -> vector<16x16xf32>
    %c0_59 = arith.constant 0 : index
    %c0_60 = arith.constant 0 : index
    %125 = vector.load %arg20[%c0_59, %c0_60] : memref<1x16xf32, #tpu.memory_space<vmem>>, vector<1x16xf32>
    %126 = vector.broadcast %125 : vector<1x16xf32> to vector<16x16xf32>
    %127 = arith.addf %124, %126 : vector<16x16xf32>
    %128 = arith.addf %122, %127 : vector<16x16xf32>
    %cst_61 = arith.constant 0.000000e+00 : f32
    %129 = vector.broadcast %cst_61 : f32 to vector<16x16xf32>
    %130 = arith.cmpf ogt, %128, %129 : vector<16x16xf32>
    %131 = vector.broadcast %92 : f32 to vector<16x16xf32>
    %132 = arith.mulf %131, %128 : vector<16x16xf32>
    %133 = arith.select %130, %128, %132 : vector<16x16xi1>, vector<16x16xf32>
    %c9 = arith.constant 9 : index
    %134 = memref.load %arg2[%c9] : memref<18xf32, #tpu.memory_space<smem>>
    %c10 = arith.constant 10 : index
    %135 = memref.load %arg2[%c10] : memref<18xf32, #tpu.memory_space<smem>>
    %c11 = arith.constant 11 : index
    %136 = memref.load %arg2[%c11] : memref<18xf32, #tpu.memory_space<smem>>
    %cst_62 = arith.constant 0.000000e+00 : f32
    %137 = vector.broadcast %cst_62 : f32 to vector<8x16xf32>
    %138 = tpu.concatenate %137, %133 in 0 : vector<8x16xf32>, vector<16x16xf32> -> vector<24x16xf32>
    %139 = vector.extract_strided_slice %138 {offsets = [6, 0], sizes = [16, 16], strides = [1, 1]} : vector<24x16xf32> to vector<16x16xf32>
    %140 = vector.extract_strided_slice %138 {offsets = [8, 0], sizes = [16, 16], strides = [1, 1]} : vector<24x16xf32> to vector<16x16xf32>
    %141 = tpu.concatenate %139, %140 in 1 : vector<16x16xf32>, vector<16x16xf32> -> vector<16x32xf32>
    %c0_63 = arith.constant 0 : index
    %c0_64 = arith.constant 0 : index
    %142 = vector.load %arg21[%c0_63, %c0_64] : memref<32x8xf32, #tpu.memory_space<vmem>>, vector<32x8xf32>
    %cst_65 = arith.constant dense<0.000000e+00> : vector<16x8xf32>
    %143 = tpu.matmul %141, %142, %cst_65 {dimension_numbers = #tpu.dot_dimension_numbers<[1], [0], [0], [1], [0, 0, 1, 1], [], []>} : vector<16x32xf32>, vector<32x8xf32>, vector<16x8xf32> -> vector<16x8xf32>
    %c0_66 = arith.constant 0 : index
    %c0_67 = arith.constant 0 : index
    %144 = vector.load %arg22[%c0_66, %c0_67] : memref<1x8xf32, #tpu.memory_space<vmem>>, vector<1x8xf32>
    %145 = vector.broadcast %144 : vector<1x8xf32> to vector<16x8xf32>
    %146 = arith.addf %143, %145 : vector<16x8xf32>
    %cst_68 = arith.constant 0.000000e+00 : f32
    %147 = vector.broadcast %cst_68 : f32 to vector<16x8xf32>
    %148 = arith.cmpf ogt, %146, %147 : vector<16x8xf32>
    %149 = vector.broadcast %134 : f32 to vector<16x8xf32>
    %150 = arith.mulf %149, %146 : vector<16x8xf32>
    %151 = arith.select %148, %146, %150 : vector<16x8xi1>, vector<16x8xf32>
    %cst_69 = arith.constant 0.000000e+00 : f32
    %152 = vector.broadcast %cst_69 : f32 to vector<8x8xf32>
    %153 = tpu.concatenate %152, %151 in 0 : vector<8x8xf32>, vector<16x8xf32> -> vector<24x8xf32>
    %154 = vector.extract_strided_slice %153 {offsets = [6, 0], sizes = [16, 8], strides = [1, 1]} : vector<24x8xf32> to vector<16x8xf32>
    %155 = vector.extract_strided_slice %153 {offsets = [8, 0], sizes = [16, 8], strides = [1, 1]} : vector<24x8xf32> to vector<16x8xf32>
    %156 = tpu.concatenate %154, %155 in 1 : vector<16x8xf32>, vector<16x8xf32> -> vector<16x16xf32>
    %c0_70 = arith.constant 0 : index
    %c0_71 = arith.constant 0 : index
    %157 = vector.load %arg23[%c0_70, %c0_71] : memref<16x8xf32, #tpu.memory_space<vmem>>, vector<16x8xf32>
    %cst_72 = arith.constant dense<0.000000e+00> : vector<16x8xf32>
    %158 = tpu.matmul %156, %157, %cst_72 {dimension_numbers = #tpu.dot_dimension_numbers<[1], [0], [0], [1], [0, 0, 1, 1], [], []>} : vector<16x16xf32>, vector<16x8xf32>, vector<16x8xf32> -> vector<16x8xf32>
    %c0_73 = arith.constant 0 : index
    %c0_74 = arith.constant 0 : index
    %159 = vector.load %arg24[%c0_73, %c0_74] : memref<1x8xf32, #tpu.memory_space<vmem>>, vector<1x8xf32>
    %160 = vector.broadcast %159 : vector<1x8xf32> to vector<16x8xf32>
    %161 = arith.addf %158, %160 : vector<16x8xf32>
    %cst_75 = arith.constant 0.000000e+00 : f32
    %162 = vector.broadcast %cst_75 : f32 to vector<16x8xf32>
    %163 = arith.cmpf ogt, %161, %162 : vector<16x8xf32>
    %164 = vector.broadcast %135 : f32 to vector<16x8xf32>
    %165 = arith.mulf %164, %161 : vector<16x8xf32>
    %166 = arith.select %163, %161, %165 : vector<16x8xi1>, vector<16x8xf32>
    %c0_76 = arith.constant 0 : index
    %c0_77 = arith.constant 0 : index
    %167 = vector.load %arg25[%c0_76, %c0_77] : memref<16x8xf32, #tpu.memory_space<vmem>>, vector<16x8xf32>
    %cst_78 = arith.constant dense<0.000000e+00> : vector<16x8xf32>
    %168 = tpu.matmul %133, %167, %cst_78 {dimension_numbers = #tpu.dot_dimension_numbers<[1], [0], [0], [1], [0, 0, 1, 1], [], []>} : vector<16x16xf32>, vector<16x8xf32>, vector<16x8xf32> -> vector<16x8xf32>
    %c0_79 = arith.constant 0 : index
    %c0_80 = arith.constant 0 : index
    %169 = vector.load %arg26[%c0_79, %c0_80] : memref<1x8xf32, #tpu.memory_space<vmem>>, vector<1x8xf32>
    %170 = vector.broadcast %169 : vector<1x8xf32> to vector<16x8xf32>
    %171 = arith.addf %168, %170 : vector<16x8xf32>
    %172 = arith.addf %166, %171 : vector<16x8xf32>
    %cst_81 = arith.constant 0.000000e+00 : f32
    %173 = vector.broadcast %cst_81 : f32 to vector<16x8xf32>
    %174 = arith.cmpf ogt, %172, %173 : vector<16x8xf32>
    %175 = vector.broadcast %136 : f32 to vector<16x8xf32>
    %176 = arith.mulf %175, %172 : vector<16x8xf32>
    %177 = arith.select %174, %172, %176 : vector<16x8xi1>, vector<16x8xf32>
    %c12 = arith.constant 12 : index
    %178 = memref.load %arg2[%c12] : memref<18xf32, #tpu.memory_space<smem>>
    %c13 = arith.constant 13 : index
    %179 = memref.load %arg2[%c13] : memref<18xf32, #tpu.memory_space<smem>>
    %c14 = arith.constant 14 : index
    %180 = memref.load %arg2[%c14] : memref<18xf32, #tpu.memory_space<smem>>
    %cst_82 = arith.constant 0.000000e+00 : f32
    %181 = vector.broadcast %cst_82 : f32 to vector<8x8xf32>
    %182 = tpu.concatenate %181, %177 in 0 : vector<8x8xf32>, vector<16x8xf32> -> vector<24x8xf32>
    %183 = vector.extract_strided_slice %182 {offsets = [7, 0], sizes = [16, 8], strides = [1, 1]} : vector<24x8xf32> to vector<16x8xf32>
    %184 = vector.extract_strided_slice %182 {offsets = [8, 0], sizes = [16, 8], strides = [1, 1]} : vector<24x8xf32> to vector<16x8xf32>
    %185 = tpu.concatenate %183, %184 in 1 : vector<16x8xf32>, vector<16x8xf32> -> vector<16x16xf32>
    %c0_83 = arith.constant 0 : index
    %c0_84 = arith.constant 0 : index
    %186 = vector.load %arg27[%c0_83, %c0_84] : memref<16x16xf32, #tpu.memory_space<vmem>>, vector<16x16xf32>
    %cst_85 = arith.constant dense<0.000000e+00> : vector<16x16xf32>
    %187 = tpu.matmul %185, %186, %cst_85 {dimension_numbers = #tpu.dot_dimension_numbers<[1], [0], [0], [1], [0, 0, 1, 1], [], []>} : vector<16x16xf32>, vector<16x16xf32>, vector<16x16xf32> -> vector<16x16xf32>
    %c0_86 = arith.constant 0 : index
    %c0_87 = arith.constant 0 : index
    %188 = vector.load %arg28[%c0_86, %c0_87] : memref<1x16xf32, #tpu.memory_space<vmem>>, vector<1x16xf32>
    %189 = vector.broadcast %188 : vector<1x16xf32> to vector<16x16xf32>
    %190 = arith.addf %187, %189 : vector<16x16xf32>
    %cst_88 = arith.constant 0.000000e+00 : f32
    %191 = vector.broadcast %cst_88 : f32 to vector<16x16xf32>
    %192 = arith.cmpf ogt, %190, %191 : vector<16x16xf32>
    %193 = vector.broadcast %178 : f32 to vector<16x16xf32>
    %194 = arith.mulf %193, %190 : vector<16x16xf32>
    %195 = arith.select %192, %190, %194 : vector<16x16xi1>, vector<16x16xf32>
    %cst_89 = arith.constant 0.000000e+00 : f32
    %196 = vector.broadcast %cst_89 : f32 to vector<8x16xf32>
    %197 = tpu.concatenate %196, %195 in 0 : vector<8x16xf32>, vector<16x16xf32> -> vector<24x16xf32>
    %198 = vector.extract_strided_slice %197 {offsets = [7, 0], sizes = [16, 16], strides = [1, 1]} : vector<24x16xf32> to vector<16x16xf32>
    %199 = vector.extract_strided_slice %197 {offsets = [8, 0], sizes = [16, 16], strides = [1, 1]} : vector<24x16xf32> to vector<16x16xf32>
    %200 = tpu.concatenate %198, %199 in 1 : vector<16x16xf32>, vector<16x16xf32> -> vector<16x32xf32>
    %c0_90 = arith.constant 0 : index
    %c0_91 = arith.constant 0 : index
    %201 = vector.load %arg29[%c0_90, %c0_91] : memref<32x16xf32, #tpu.memory_space<vmem>>, vector<32x16xf32>
    %cst_92 = arith.constant dense<0.000000e+00> : vector<16x16xf32>
    %202 = tpu.matmul %200, %201, %cst_92 {dimension_numbers = #tpu.dot_dimension_numbers<[1], [0], [0], [1], [0, 0, 1, 1], [], []>} : vector<16x32xf32>, vector<32x16xf32>, vector<16x16xf32> -> vector<16x16xf32>
    %c0_93 = arith.constant 0 : index
    %c0_94 = arith.constant 0 : index
    %203 = vector.load %arg30[%c0_93, %c0_94] : memref<1x16xf32, #tpu.memory_space<vmem>>, vector<1x16xf32>
    %204 = vector.broadcast %203 : vector<1x16xf32> to vector<16x16xf32>
    %205 = arith.addf %202, %204 : vector<16x16xf32>
    %cst_95 = arith.constant 0.000000e+00 : f32
    %206 = vector.broadcast %cst_95 : f32 to vector<16x16xf32>
    %207 = arith.cmpf ogt, %205, %206 : vector<16x16xf32>
    %208 = vector.broadcast %179 : f32 to vector<16x16xf32>
    %209 = arith.mulf %208, %205 : vector<16x16xf32>
    %210 = arith.select %207, %205, %209 : vector<16x16xi1>, vector<16x16xf32>
    %c0_96 = arith.constant 0 : index
    %c0_97 = arith.constant 0 : index
    %211 = vector.load %arg31[%c0_96, %c0_97] : memref<8x16xf32, #tpu.memory_space<vmem>>, vector<8x16xf32>
    %cst_98 = arith.constant dense<0.000000e+00> : vector<16x16xf32>
    %212 = tpu.matmul %177, %211, %cst_98 {dimension_numbers = #tpu.dot_dimension_numbers<[1], [0], [0], [1], [0, 0, 1, 1], [], []>} : vector<16x8xf32>, vector<8x16xf32>, vector<16x16xf32> -> vector<16x16xf32>
    %c0_99 = arith.constant 0 : index
    %c0_100 = arith.constant 0 : index
    %213 = vector.load %arg32[%c0_99, %c0_100] : memref<1x16xf32, #tpu.memory_space<vmem>>, vector<1x16xf32>
    %214 = vector.broadcast %213 : vector<1x16xf32> to vector<16x16xf32>
    %215 = arith.addf %212, %214 : vector<16x16xf32>
    %216 = arith.addf %210, %215 : vector<16x16xf32>
    %cst_101 = arith.constant 0.000000e+00 : f32
    %217 = vector.broadcast %cst_101 : f32 to vector<16x16xf32>
    %218 = arith.cmpf ogt, %216, %217 : vector<16x16xf32>
    %219 = vector.broadcast %180 : f32 to vector<16x16xf32>
    %220 = arith.mulf %219, %216 : vector<16x16xf32>
    %221 = arith.select %218, %216, %220 : vector<16x16xi1>, vector<16x16xf32>
    %c15 = arith.constant 15 : index
    %222 = memref.load %arg2[%c15] : memref<18xf32, #tpu.memory_space<smem>>
    %c16 = arith.constant 16 : index
    %223 = memref.load %arg2[%c16] : memref<18xf32, #tpu.memory_space<smem>>
    %c17 = arith.constant 17 : index
    %224 = memref.load %arg2[%c17] : memref<18xf32, #tpu.memory_space<smem>>
    %cst_102 = arith.constant 0.000000e+00 : f32
    %225 = vector.broadcast %cst_102 : f32 to vector<8x16xf32>
    %226 = tpu.concatenate %225, %221 in 0 : vector<8x16xf32>, vector<16x16xf32> -> vector<24x16xf32>
    %227 = vector.extract_strided_slice %226 {offsets = [6, 0], sizes = [16, 16], strides = [1, 1]} : vector<24x16xf32> to vector<16x16xf32>
    %228 = vector.extract_strided_slice %226 {offsets = [8, 0], sizes = [16, 16], strides = [1, 1]} : vector<24x16xf32> to vector<16x16xf32>
    %229 = tpu.concatenate %227, %228 in 1 : vector<16x16xf32>, vector<16x16xf32> -> vector<16x32xf32>
    %c0_103 = arith.constant 0 : index
    %c0_104 = arith.constant 0 : index
    %230 = vector.load %arg33[%c0_103, %c0_104] : memref<32x8xf32, #tpu.memory_space<vmem>>, vector<32x8xf32>
    %cst_105 = arith.constant dense<0.000000e+00> : vector<16x8xf32>
    %231 = tpu.matmul %229, %230, %cst_105 {dimension_numbers = #tpu.dot_dimension_numbers<[1], [0], [0], [1], [0, 0, 1, 1], [], []>} : vector<16x32xf32>, vector<32x8xf32>, vector<16x8xf32> -> vector<16x8xf32>
    %c0_106 = arith.constant 0 : index
    %c0_107 = arith.constant 0 : index
    %232 = vector.load %arg34[%c0_106, %c0_107] : memref<1x8xf32, #tpu.memory_space<vmem>>, vector<1x8xf32>
    %233 = vector.broadcast %232 : vector<1x8xf32> to vector<16x8xf32>
    %234 = arith.addf %231, %233 : vector<16x8xf32>
    %cst_108 = arith.constant 0.000000e+00 : f32
    %235 = vector.broadcast %cst_108 : f32 to vector<16x8xf32>
    %236 = arith.cmpf ogt, %234, %235 : vector<16x8xf32>
    %237 = vector.broadcast %222 : f32 to vector<16x8xf32>
    %238 = arith.mulf %237, %234 : vector<16x8xf32>
    %239 = arith.select %236, %234, %238 : vector<16x8xi1>, vector<16x8xf32>
    %cst_109 = arith.constant 0.000000e+00 : f32
    %240 = vector.broadcast %cst_109 : f32 to vector<8x8xf32>
    %241 = tpu.concatenate %240, %239 in 0 : vector<8x8xf32>, vector<16x8xf32> -> vector<24x8xf32>
    %242 = vector.extract_strided_slice %241 {offsets = [6, 0], sizes = [16, 8], strides = [1, 1]} : vector<24x8xf32> to vector<16x8xf32>
    %243 = vector.extract_strided_slice %241 {offsets = [8, 0], sizes = [16, 8], strides = [1, 1]} : vector<24x8xf32> to vector<16x8xf32>
    %244 = tpu.concatenate %242, %243 in 1 : vector<16x8xf32>, vector<16x8xf32> -> vector<16x16xf32>
    %c0_110 = arith.constant 0 : index
    %c0_111 = arith.constant 0 : index
    %245 = vector.load %arg35[%c0_110, %c0_111] : memref<16x8xf32, #tpu.memory_space<vmem>>, vector<16x8xf32>
    %cst_112 = arith.constant dense<0.000000e+00> : vector<16x8xf32>
    %246 = tpu.matmul %244, %245, %cst_112 {dimension_numbers = #tpu.dot_dimension_numbers<[1], [0], [0], [1], [0, 0, 1, 1], [], []>} : vector<16x16xf32>, vector<16x8xf32>, vector<16x8xf32> -> vector<16x8xf32>
    %c0_113 = arith.constant 0 : index
    %c0_114 = arith.constant 0 : index
    %247 = vector.load %arg36[%c0_113, %c0_114] : memref<1x8xf32, #tpu.memory_space<vmem>>, vector<1x8xf32>
    %248 = vector.broadcast %247 : vector<1x8xf32> to vector<16x8xf32>
    %249 = arith.addf %246, %248 : vector<16x8xf32>
    %cst_115 = arith.constant 0.000000e+00 : f32
    %250 = vector.broadcast %cst_115 : f32 to vector<16x8xf32>
    %251 = arith.cmpf ogt, %249, %250 : vector<16x8xf32>
    %252 = vector.broadcast %223 : f32 to vector<16x8xf32>
    %253 = arith.mulf %252, %249 : vector<16x8xf32>
    %254 = arith.select %251, %249, %253 : vector<16x8xi1>, vector<16x8xf32>
    %c0_116 = arith.constant 0 : index
    %c0_117 = arith.constant 0 : index
    %255 = vector.load %arg37[%c0_116, %c0_117] : memref<16x8xf32, #tpu.memory_space<vmem>>, vector<16x8xf32>
    %cst_118 = arith.constant dense<0.000000e+00> : vector<16x8xf32>
    %256 = tpu.matmul %221, %255, %cst_118 {dimension_numbers = #tpu.dot_dimension_numbers<[1], [0], [0], [1], [0, 0, 1, 1], [], []>} : vector<16x16xf32>, vector<16x8xf32>, vector<16x8xf32> -> vector<16x8xf32>
    %c0_119 = arith.constant 0 : index
    %c0_120 = arith.constant 0 : index
    %257 = vector.load %arg38[%c0_119, %c0_120] : memref<1x8xf32, #tpu.memory_space<vmem>>, vector<1x8xf32>
    %258 = vector.broadcast %257 : vector<1x8xf32> to vector<16x8xf32>
    %259 = arith.addf %256, %258 : vector<16x8xf32>
    %260 = arith.addf %254, %259 : vector<16x8xf32>
    %cst_121 = arith.constant 0.000000e+00 : f32
    %261 = vector.broadcast %cst_121 : f32 to vector<16x8xf32>
    %262 = arith.cmpf ogt, %260, %261 : vector<16x8xf32>
    %263 = vector.broadcast %224 : f32 to vector<16x8xf32>
    %264 = arith.mulf %263, %260 : vector<16x8xf32>
    %265 = arith.select %262, %260, %264 : vector<16x8xi1>, vector<16x8xf32>
    %c0_122 = arith.constant 0 : index
    %c0_123 = arith.constant 0 : index
    %c0_124 = arith.constant 0 : index
    %266 = vector.load %arg39[%c0_122, %c0_123, %c0_124] : memref<1x16x8xf32, #tpu.memory_space<vmem>>, vector<1x16x8xf32>
    %267 = vector.shape_cast %266 : vector<1x16x8xf32> to vector<16x8xf32>
    %268 = vector.shape_cast %265 : vector<16x8xf32> to vector<1x16x8xf32>
    tpu.vector_store %arg39[%c0_122, %c0_123, %c0_124], %268 {strides = array<i32>} : memref<1x16x8xf32, #tpu.memory_space<vmem>>, vector<1x16x8xf32>,
    return
  }
  func.func @transform_0(%arg0: i32) -> (i32, i32, i32) {
    %c0_i32 = arith.constant 0 : i32
    %c0_i32_0 = arith.constant 0 : i32
    %c0_i32_1 = arith.constant 0 : i32
    return %arg0, %c0_i32, %c0_i32_0 : i32, i32, i32
  }
  func.func @transform_1(%arg0: i32) -> i32 {
    %c0_i32 = arith.constant 0 : i32
    %c0_i32_0 = arith.constant 0 : i32
    return %c0_i32 : i32
  }
  func.func @transform_2(%arg0: i32) -> (i32, i32) {
    %c0_i32 = arith.constant 0 : i32
    %c0_i32_0 = arith.constant 0 : i32
    %c0_i32_1 = arith.constant 0 : i32
    return %c0_i32, %c0_i32_0 : i32, i32
  }
  func.func @transform_3(%arg0: i32) -> (i32, i32) {
    %c0_i32 = arith.constant 0 : i32
    %c0_i32_0 = arith.constant 0 : i32
    %c0_i32_1 = arith.constant 0 : i32
    return %c0_i32, %c0_i32_0 : i32, i32
  }
  func.func @transform_4(%arg0: i32) -> (i32, i32) {
    %c0_i32 = arith.constant 0 : i32
    %c0_i32_0 = arith.constant 0 : i32
    %c0_i32_1 = arith.constant 0 : i32
    return %c0_i32, %c0_i32_0 : i32, i32
  }
  func.func @transform_5(%arg0: i32) -> (i32, i32) {
    %c0_i32 = arith.constant 0 : i32
    %c0_i32_0 = arith.constant 0 : i32
    %c0_i32_1 = arith.constant 0 : i32
    return %c0_i32, %c0_i32_0 : i32, i32
  }
  func.func @transform_6(%arg0: i32) -> (i32, i32) {
    %c0_i32 = arith.constant 0 : i32
    %c0_i32_0 = arith.constant 0 : i32
    %c0_i32_1 = arith.constant 0 : i32
    return %c0_i32, %c0_i32_0 : i32, i32
  }
  func.func @transform_7(%arg0: i32) -> (i32, i32) {
    %c0_i32 = arith.constant 0 : i32
    %c0_i32_0 = arith.constant 0 : i32
    %c0_i32_1 = arith.constant 0 : i32
    return %c0_i32, %c0_i32_0 : i32, i32
  }
  func.func @transform_8(%arg0: i32) -> (i32, i32) {
    %c0_i32 = arith.constant 0 : i32
    %c0_i32_0 = arith.constant 0 : i32
    %c0_i32_1 = arith.constant 0 : i32
    return %c0_i32, %c0_i32_0 : i32, i32
  }
  func.func @transform_9(%arg0: i32) -> (i32, i32) {
    %c0_i32 = arith.constant 0 : i32
    %c0_i32_0 = arith.constant 0 : i32
    %c0_i32_1 = arith.constant 0 : i32
    return %c0_i32, %c0_i32_0 : i32, i32
  }
  func.func @transform_10(%arg0: i32) -> (i32, i32) {
    %c0_i32 = arith.constant 0 : i32
    %c0_i32_0 = arith.constant 0 : i32
    %c0_i32_1 = arith.constant 0 : i32
    return %c0_i32, %c0_i32_0 : i32, i32
  }
  func.func @transform_11(%arg0: i32) -> (i32, i32) {
    %c0_i32 = arith.constant 0 : i32
    %c0_i32_0 = arith.constant 0 : i32
    %c0_i32_1 = arith.constant 0 : i32
    return %c0_i32, %c0_i32_0 : i32, i32
  }
  func.func @transform_12(%arg0: i32) -> (i32, i32) {
    %c0_i32 = arith.constant 0 : i32
    %c0_i32_0 = arith.constant 0 : i32
    %c0_i32_1 = arith.constant 0 : i32
    return %c0_i32, %c0_i32_0 : i32, i32
  }
  func.func @transform_13(%arg0: i32) -> (i32, i32) {
    %c0_i32 = arith.constant 0 : i32
    %c0_i32_0 = arith.constant 0 : i32
    %c0_i32_1 = arith.constant 0 : i32
    return %c0_i32, %c0_i32_0 : i32, i32
  }
  func.func @transform_14(%arg0: i32) -> (i32, i32) {
    %c0_i32 = arith.constant 0 : i32
    %c0_i32_0 = arith.constant 0 : i32
    %c0_i32_1 = arith.constant 0 : i32
    return %c0_i32, %c0_i32_0 : i32, i32
  }
  func.func @transform_15(%arg0: i32) -> (i32, i32) {
    %c0_i32 = arith.constant 0 : i32
    %c0_i32_0 = arith.constant 0 : i32
    %c0_i32_1 = arith.constant 0 : i32
    return %c0_i32, %c0_i32_0 : i32, i32
  }
  func.func @transform_16(%arg0: i32) -> (i32, i32) {
    %c0_i32 = arith.constant 0 : i32
    %c0_i32_0 = arith.constant 0 : i32
    %c0_i32_1 = arith.constant 0 : i32
    return %c0_i32, %c0_i32_0 : i32, i32
  }
  func.func @transform_17(%arg0: i32) -> (i32, i32) {
    %c0_i32 = arith.constant 0 : i32
    %c0_i32_0 = arith.constant 0 : i32
    %c0_i32_1 = arith.constant 0 : i32
    return %c0_i32, %c0_i32_0 : i32, i32
  }
  func.func @transform_18(%arg0: i32) -> (i32, i32) {
    %c0_i32 = arith.constant 0 : i32
    %c0_i32_0 = arith.constant 0 : i32
    %c0_i32_1 = arith.constant 0 : i32
    return %c0_i32, %c0_i32_0 : i32, i32
  }
  func.func @transform_19(%arg0: i32) -> (i32, i32) {
    %c0_i32 = arith.constant 0 : i32
    %c0_i32_0 = arith.constant 0 : i32
    %c0_i32_1 = arith.constant 0 : i32
    return %c0_i32, %c0_i32_0 : i32, i32
  }
  func.func @transform_20(%arg0: i32) -> (i32, i32) {
    %c0_i32 = arith.constant 0 : i32
    %c0_i32_0 = arith.constant 0 : i32
    %c0_i32_1 = arith.constant 0 : i32
    return %c0_i32, %c0_i32_0 : i32, i32
  }
  func.func @transform_21(%arg0: i32) -> (i32, i32) {
    %c0_i32 = arith.constant 0 : i32
    %c0_i32_0 = arith.constant 0 : i32
    %c0_i32_1 = arith.constant 0 : i32
    return %c0_i32, %c0_i32_0 : i32, i32
  }
  func.func @transform_22(%arg0: i32) -> (i32, i32) {
    %c0_i32 = arith.constant 0 : i32
    %c0_i32_0 = arith.constant 0 : i32
    %c0_i32_1 = arith.constant 0 : i32
    return %c0_i32, %c0_i32_0 : i32, i32
  }
  func.func @transform_23(%arg0: i32) -> (i32, i32) {
    %c0_i32 = arith.constant 0 : i32
    %c0_i32_0 = arith.constant 0 : i32
    %c0_i32_1 = arith.constant 0 : i32
    return %c0_i32, %c0_i32_0 : i32, i32
  }
  func.func @transform_24(%arg0: i32) -> (i32, i32) {
    %c0_i32 = arith.constant 0 : i32
    %c0_i32_0 = arith.constant 0 : i32
    %c0_i32_1 = arith.constant 0 : i32
    return %c0_i32, %c0_i32_0 : i32, i32
  }
  func.func @transform_25(%arg0: i32) -> (i32, i32) {
    %c0_i32 = arith.constant 0 : i32
    %c0_i32_0 = arith.constant 0 : i32
    %c0_i32_1 = arith.constant 0 : i32
    return %c0_i32, %c0_i32_0 : i32, i32
  }
  func.func @transform_26(%arg0: i32) -> (i32, i32) {
    %c0_i32 = arith.constant 0 : i32
    %c0_i32_0 = arith.constant 0 : i32
    %c0_i32_1 = arith.constant 0 : i32
    return %c0_i32, %c0_i32_0 : i32, i32
  }
  func.func @transform_27(%arg0: i32) -> (i32, i32) {
    %c0_i32 = arith.constant 0 : i32
    %c0_i32_0 = arith.constant 0 : i32
    %c0_i32_1 = arith.constant 0 : i32
    return %c0_i32, %c0_i32_0 : i32, i32
  }
  func.func @transform_28(%arg0: i32) -> (i32, i32) {
    %c0_i32 = arith.constant 0 : i32
    %c0_i32_0 = arith.constant 0 : i32
    %c0_i32_1 = arith.constant 0 : i32
    return %c0_i32, %c0_i32_0 : i32, i32
  }
  func.func @transform_29(%arg0: i32) -> (i32, i32) {
    %c0_i32 = arith.constant 0 : i32
    %c0_i32_0 = arith.constant 0 : i32
    %c0_i32_1 = arith.constant 0 : i32
    return %c0_i32, %c0_i32_0 : i32, i32
  }
  func.func @transform_30(%arg0: i32) -> (i32, i32) {
    %c0_i32 = arith.constant 0 : i32
    %c0_i32_0 = arith.constant 0 : i32
    %c0_i32_1 = arith.constant 0 : i32
    return %c0_i32, %c0_i32_0 : i32, i32
  }
  func.func @transform_31(%arg0: i32) -> (i32, i32) {
    %c0_i32 = arith.constant 0 : i32
    %c0_i32_0 = arith.constant 0 : i32
    %c0_i32_1 = arith.constant 0 : i32
    return %c0_i32, %c0_i32_0 : i32, i32
  }
  func.func @transform_32(%arg0: i32) -> (i32, i32) {
    %c0_i32 = arith.constant 0 : i32
    %c0_i32_0 = arith.constant 0 : i32
    %c0_i32_1 = arith.constant 0 : i32
    return %c0_i32, %c0_i32_0 : i32, i32
  }
  func.func @transform_33(%arg0: i32) -> (i32, i32) {
    %c0_i32 = arith.constant 0 : i32
    %c0_i32_0 = arith.constant 0 : i32
    %c0_i32_1 = arith.constant 0 : i32
    return %c0_i32, %c0_i32_0 : i32, i32
  }
  func.func @transform_34(%arg0: i32) -> (i32, i32) {
    %c0_i32 = arith.constant 0 : i32
    %c0_i32_0 = arith.constant 0 : i32
    %c0_i32_1 = arith.constant 0 : i32
    return %c0_i32, %c0_i32_0 : i32, i32
  }
  func.func @transform_35(%arg0: i32) -> (i32, i32) {
    %c0_i32 = arith.constant 0 : i32
    %c0_i32_0 = arith.constant 0 : i32
    %c0_i32_1 = arith.constant 0 : i32
    return %c0_i32, %c0_i32_0 : i32, i32
  }
  func.func @transform_36(%arg0: i32) -> (i32, i32) {
    %c0_i32 = arith.constant 0 : i32
    %c0_i32_0 = arith.constant 0 : i32
    %c0_i32_1 = arith.constant 0 : i32
    return %c0_i32, %c0_i32_0 : i32, i32
  }
  func.func @transform_37(%arg0: i32) -> (i32, i32) {
    %c0_i32 = arith.constant 0 : i32
    %c0_i32_0 = arith.constant 0 : i32
    %c0_i32_1 = arith.constant 0 : i32
    return %c0_i32, %c0_i32_0 : i32, i32
  }
  func.func @transform_38(%arg0: i32) -> (i32, i32, i32) {
    %c0_i32 = arith.constant 0 : i32
    %c0_i32_0 = arith.constant 0 : i32
    %c0_i32_1 = arith.constant 0 : i32
    return %arg0, %c0_i32, %c0_i32_0 : i32, i32, i32
  }
}

</mosaic_0001>

<bundles_post_ra>
// kernel: tpu_custom_call.1
= control target key start
LH: loop header
LB: loop body
LE: loop exit
PB: predicated region body
PF: predicated region fallthrough
CT: control target
= control target key end

     0   :  { %s3731_s6 = smov 1   ;;  %s3732_s10 = smov 2   ;;  %s4242_s0 = inlined_call_operand.smem [shape: u32[39], index: -1, kind: input, shape index: {}] }
   0x1   :  { %s3780_s5 = sld [smem:[%s4242_s0]]   ;;  %s3733_s14 = smov 3  }
   0x2   :  { %s3785_s9 = sld [smem:[%s4242_s0 + %s3731_s6]]   ;;  %s3734_s18 = smov 4  }
   0x3   :  { %s3790_s13 = sld [smem:[%s4242_s0 + %s3732_s10]]   ;;  %s3735_s22 = smov 5  }
   0x4   :  { %s3795_s17 = sld [smem:[%s4242_s0 + %s3733_s14]]   ;;  %s3736_s26 = smov 6  }
   0x5   :  { %s3800_s21 = sld [smem:[%s4242_s0 + %s3734_s18]]   ;;  %s3737_s30 = smov 7  }
   0x6   :  { %s3805_s25 = sld [smem:[%s4242_s0 + %s3735_s22]]   ;;  %s3738_s4 = smov 8  }
   0x7   :  { %s3810_s29 = sld [smem:[%s4242_s0 + %s3736_s26]]   ;;  %s3739_s10 = smov 9  }
   0x8   :  { %s3815_s3 = sld [smem:[%s4242_s0 + %s3737_s30]]   ;;  %s3740_s15 = smov 10  }
   0x9   :  { %s3820_s8 = sld [smem:[%s4242_s0 + %s3738_s4]]   ;;  %s3741_s20 = smov 11  }
   0xa   :  { %s3825_s14 = sld [smem:[%s4242_s0 + %s3739_s10]]   ;;  %s3742_s26 = smov 12  }
   0xb   :  { %s3830_s19 = sld [smem:[%s4242_s0 + %s3740_s15]]   ;;  %s3743_s1 = smov 13  }
   0xc   :  { %s3835_s24 = sld [smem:[%s4242_s0 + %s3741_s20]]   ;;  %s3744_s7 = smov 14  }
   0xd   :  { %s3840_s30 = sld [smem:[%s4242_s0 + %s3742_s26]]   ;;  %s3745_s15 = smov 15  }
   0xe   :  { %4259 = sst [smem:[#allocation5_spill]] %s3815_s3  ;;  %s3746_s22 = smov 16  }
   0xf   :  { %s3845_s6 = sld [smem:[%s4242_s0 + %s3743_s1]]   ;;  %s3747_s28 = smov 17  }
  0x10   :  { %s3850_s12 = sld [smem:[%s4242_s0 + %s3744_s7]]   ;;  %s3748_s7 = smov 18  }
  0x11   :  { %s3855_s20 = sld [smem:[%s4242_s0 + %s3745_s15]]   ;;  %s3749_s15 = smov 19  }
  0x12   :  { %s3860_s27 = sld [smem:[%s4242_s0 + %s3746_s22]]   ;;  %s3750_s22 = smov 20  }
  0x13   :  { %s3865_s4 = sld [smem:[%s4242_s0 + %s3747_s28]]   ;;  %s3751_s28 = smov 21  }
  0x16   :  { %4260 = sst [smem:[#allocation6_spill]] %s3850_s12 }
  0x17   :  { %4261 = sst [smem:[#allocation7_spill]] %s3855_s20 }
  0x18   :  { %4262 = sst [smem:[#allocation8_spill]] %s3860_s27 }
  0x19   :  { %4263 = sst [smem:[#allocation9_spill]] %s3865_s4 }
  0x1a   :  { %s3870_s12 = sld [smem:[%s4242_s0 + %s3748_s7]]   ;;  %s3752_s7 = smov 22  }
  0x1b   :  { %s3875_s20 = sld [smem:[%s4242_s0 + %s3749_s15]]   ;;  %s3753_s15 = smov 23  }
  0x1c   :  { %s3880_s27 = sld [smem:[%s4242_s0 + %s3750_s22]]   ;;  %s3754_s22 = smov 24  }
  0x1d   :  { %s3885_s4 = sld [smem:[%s4242_s0 + %s3751_s28]]   ;;  %s3755_s28 = smov 25  }
  0x20   :  { %4264 = sst [smem:[#allocation10_spill]] %s3870_s12 }
  0x21   :  { %4265 = sst [smem:[#allocation11_spill]] %s3875_s20 }
  0x22   :  { %4266 = sst [smem:[#allocation12_spill]] %s3880_s27 }
  0x23   :  { %4267 = sst [smem:[#allocation13_spill]] %s3885_s4 }
  0x24   :  { %s3890_s12 = sld [smem:[%s4242_s0 + %s3752_s7]]   ;;  %s3756_s7 = smov 26  }
  0x25   :  { %s3895_s20 = sld [smem:[%s4242_s0 + %s3753_s15]]   ;;  %s3757_s15 = smov 27  }
  0x26   :  { %s3900_s27 = sld [smem:[%s4242_s0 + %s3754_s22]]   ;;  %s3758_s22 = smov 28  }
  0x27   :  { %s3905_s4 = sld [smem:[%s4242_s0 + %s3755_s28]]   ;;  %s3759_s28 = smov 29  }
  0x2a   :  { %4268 = sst [smem:[#allocation14_spill]] %s3890_s12 }
  0x2b   :  { %4269 = sst [smem:[#allocation15_spill]] %s3895_s20 }
  0x2c   :  { %4270 = sst [smem:[#allocation16_spill]] %s3900_s27 }
  0x2d   :  { %4271 = sst [smem:[#allocation17_spill]] %s3905_s4 }
  0x2e   :  { %s3910_s12 = sld [smem:[%s4242_s0 + %s3756_s7]]   ;;  %s3760_s7 = smov 30  }
  0x2f   :  { %s3915_s20 = sld [smem:[%s4242_s0 + %s3757_s15]]   ;;  %s3761_s15 = smov 31  }
  0x30   :  { %s3920_s27 = sld [smem:[%s4242_s0 + %s3758_s22]]   ;;  %s3762_s22 = smov 32  }
  0x31   :  { %s3925_s4 = sld [smem:[%s4242_s0 + %s3759_s28]]   ;;  %s3763_s28 = smov 33  }
  0x34   :  { %4272 = sst [smem:[#allocation18_spill]] %s3910_s12 }
  0x35   :  { %4273 = sst [smem:[#allocation19_spill]] %s3915_s20 }
  0x36   :  { %4274 = sst [smem:[#allocation20_spill]] %s3920_s27 }
  0x37   :  { %4275 = sst [smem:[#allocation21_spill]] %s3925_s4 }
  0x38   :  { %s3930_s12 = sld [smem:[%s4242_s0 + %s3760_s7]]   ;;  %s3764_s7 = smov 34  }
  0x39   :  { %s3935_s20 = sld [smem:[%s4242_s0 + %s3761_s15]]   ;;  %s3765_s15 = smov 35  }
  0x3a   :  { %s3940_s27 = sld [smem:[%s4242_s0 + %s3762_s22]]   ;;  %s3766_s22 = smov 36  }
  0x3b   :  { %s3945_s4 = sld [smem:[%s4242_s0 + %s3763_s28]]   ;;  %s3767_s28 = smov 37  }
  0x3e   :  { %4276 = sst [smem:[#allocation22_spill]] %s3930_s12 }
  0x3f   :  { %4277 = sst [smem:[#allocation23_spill]] %s3935_s20 }
  0x40   :  { %4278 = sst [smem:[#allocation24_spill]] %s3940_s27 }
  0x41   :  { %4279 = sst [smem:[#allocation25_spill]] %s3945_s4 }
  0x42   :  { %s3950_s12 = sld [smem:[%s4242_s0 + %s3764_s7]]   ;;  %s3768_s7 = smov 38  }
  0x43   :  { %s3955_s20 = sld [smem:[%s4242_s0 + %s3765_s15]]  }
  0x44   :  { %s3960_s27 = sld [smem:[%s4242_s0 + %s3766_s22]]  }
  0x45   :  { %s3965_s4 = sld [smem:[%s4242_s0 + %s3767_s28]]  }
  0x48   :  { %4280 = sst [smem:[#allocation26_spill]] %s3950_s12 }
  0x49   :  { %s3970_s12 = sld [smem:[%s4242_s0 + %s3768_s7]]  }
  0x4a   :  { %82 = vsyncpa [#allocation3], 0  ;;  %s3972_s15 = smov 0  }
  0x4b LB: > { %s3334_s16 = sadd.s32 4294967295, %s3729_s15   ;;  %p3336_p0 = scmp.ge.s32.totalorder %s3729_s15, 1  ;;  %s3729_s15 = sphi %s3972_s15, %s88_s15  }
  0x4c   : > { %p922_p1 = scmp.lt.s32.totalorder %s3729_s15, 3  ;;  %s935_s18 = sshll.u32 %s3785_s9, 4  ;;  %s936_s18 = int_to_ptr.vmem [resolvable:$true] %s935_s18 }
  0x4d   : > { %p3653_p3 = scmp.eq.s32.totalorder %s3334_s16, 0  ;;  %s3704_s0 = scalar_lea.vmem %s936_s18, 16 }
  0x4e   : > { %p3981_p2 = pnand %p3336_p0, %p922_p1  ;;  %p3705_p6 = scmp.ne.s32.totalorder %s936_s18, %s3704_s0 }
  0x4f   : > { %p3712_p10 = scmp.lt.s32.totalorder %s936_s18, %s936_s18  ;;  %p3713_p11 = scmp.lt.s32.totalorder %s3704_s0, %s3704_s0 }
  0x50   : > { %p3649_p4 = pneg %p3981_p2 }
  0x51   : > { %p3714_p12 = por %p3713_p11, %p3712_p10 }
  0x52   : > { %p3650_p5 = pnand %p3653_p3, %p3649_p4 }
  0x54   : > { %p3706_p7 = pneg %p3650_p5 }
  0x56   : > { %p3707_p8 = pnand %p3706_p7, %p3705_p6 }
  0x58   : > { %p3708_p9 = pneg %p3707_p8 }
  0x5a   : > { %p3715_p13 = pnand %p3714_p12, %p3708_p9 }
  0x5c   : > { %3718 = shalt.err (!%p3715_p13)
}
  0x5d   : > { %s3769_s23 = smov [#allocation2]   ;;  %1064 = sbr.rel (%p3981_p2) target bundleno = 4042 (0xfca), region = 172 }
  0x5e   : > { %3652 = dma.vmem_to_smem (!%p3650_p5), %s936_s18, 16, %s3769_s23, [#allocation3]  }
  0x62   : > { %3724 = dma.done.wait (%p3653_p3), [#allocation3], 16  }
  0x63   : > { %3726 = vsyncadd (%p3653_p3), [#allocation3], 4294967280 }
  0x64   : > { %1070 = sfence }
  0x65   : > { %p1159_p0 = scmp.lt.s32.totalorder %s3334_s16, 1  ;;  %v1194_v0 = vld [vmem:[%s3790_s13 + $0x8] sm:$0xff]  ;;  %v1193_v1 = vld [vmem:[%s3790_s13] sm:$0xff]  ;;  %vm1176_vm0 = vcmask 1046528   ;;  %s4255_s1 = smov 8   ;;  %vm1189_vm1 = vcmask 64512  }
  0x66   : > { %3501 = vmatprep.subr.mxu0 %v1194_v0  ;;  %vm1205_vm2 = vcmask 1040384   ;;  %vm1211_vm3 = vcmask 130048   ;;  %s1171_s2 = sld [smem:[#allocation2]]  ;;  %v1318_v18 = vld [vmem:[%s3800_s21 + $0x18] sm:$0xff]  ;;  %v3347_v19 = vld [vmem:[%s3795_s17] ss:$0 sm:$0xff] }
  0x67   : > { %s4308_s16 = smov (!%p1159_p0, %s3334_s16), 1  ;;  %3502 = vmatpush3.msra.mxu0 %v1194_v0  ;;  %3508 = vmatprep.subr.mxu1 %v1318_v18  ;;  %v1317_v20 = vld [vmem:[%s3800_s21 + $0x10] sm:$0xff]  ;;  %v1316_v23 = vld [vmem:[%s3800_s21 + $0x8] sm:$0xff]  ;;  %v1315_v26 = vld [vmem:[%s3800_s21] sm:$0xff]  ;;  %s4253_s7 = smov 16   ;;  %vm1334_vm6 = vcmask 261120  }
  0x68   : > { %3503 = vmatprep.subr.mxu0 %v1193_v1  ;;  %s4252_s26 = sshll.u32 %s4308_s16, 4  ;;  %3509 = vmatpush3.msra.mxu1 %v1318_v18  ;;  %v1421_v27 = vld [vmem:[%s3810_s29] sm:$0xff]  ;;  %s4282_s3 = sld [smem:[#allocation5_spill]]  ;;  %v1541_v53 = vld [vmem:[%s3820_s8 + $0x18] sm:$0xff]  ;;  %v1540_v59 = vld [vmem:[%s3820_s8 + $0x10] sm:$0xff]  ;;  %vm1522_vm11 = vcmask 1045504  }
  0x69   : > { %3504 = vmatpush3.msra.mxu0 %v1193_v1  ;;  %s1163_s28 = scalar_lea.vmem %s3780_s5, %s4252_s26  ;;  %3510 = vmatprep.subr.mxu1 %v1317_v20  ;;  %s3345_s10 = sld [smem:[#allocation2 + $0x1]]  ;;  %v3350_v47 = vld [vmem:[%s3805_s25] ss:$0 sm:$0xff]  ;;  %v1539_v63 = vld [vmem:[%s3820_s8 + $0x8] sm:$0xff]  ;;  %vm1552_vm12 = vcmask 1041408  }
  0x6a   : > { %v1169_v2 = vld [vmem:[%s1163_s28] sm:$0xff]  ;;  %v1170_v3 = vld [vmem:[%s1163_s28 + $0x8] sm:$0xff]  ;;  %3511 = vmatpush3.msra.mxu1 %v1317_v20  ;;  %3519 = vmatprep.subr.mxu0 %v1421_v27  ;;  %s4030_s11 = sld [smem:[#allocation2 + $0x2]] }
  0x6b   : > { %v1177_v4 = vrot.slane %v1169_v2, 1  ;;  %v1178_v5 = vrot.slane %v1170_v3, 1  ;;  %3512 = vmatprep.subr.mxu1 %v1316_v23  ;;  %s3356_s18 = sld [smem:[#allocation2 + $0x3]] }
  0x6c   : > { %v1293_v22 = vstv %s1171_s2  ;;  %3513 = vmatpush3.msra.mxu1 %v1316_v23  ;;  %v3359_v23 = vld [vmem:[%s3825_s14] ss:$0 sm:$0xff]  ;;  %s3357_s22 = sld [smem:[#allocation2 + $0x4]] }
  0x6d   : > { %1180 = vrot.lane.b32.xlu0 %v1177_v4, %s4255_s1  ;;  %1184 = vrot.lane.b32.xlu1 %v1178_v5, %s4255_s1  ;;  %v1179_v6 = vsel %vm1176_vm0, %v1177_v4, %v1178_v5  ;;  %s4283_s0 = sld [smem:[#allocation6_spill]] }
  0x6e   : > { %3514 = vmatprep.subr.mxu1 %v1315_v26  ;;  %v3353_v49 = vld [vmem:[%s4282_s3] ss:$0 sm:$0xff]  ;;  %s3358_s23 = sld [smem:[#allocation2 + $0x5]] }
  0x6f   : > { %3515 = vmatpush3.msra.mxu1 %v1315_v26  ;;  %v1416_v51 = vstv %s3345_s10  ;;  %s4284_s28 = sld [smem:[#allocation10_spill]] }
  0x70   : > { %v1512_v61 = vstv %s4030_s11  ;;  %s4285_s2 = sld [smem:[#allocation8_spill]] }
  0x71   : > { %1182 = vrot.lane.b32.xlu0 %v1179_v6, %s4255_s1  ;;  %v1639_v26 = vstv %s3356_s18  ;;  %s4286_s10 = sld [smem:[#allocation7_spill]] }
  0x72   : > { %s3368_s11 = sld [smem:[#allocation2 + $0x6]] }
  0x73   : > { %s4287_s18 = sld [smem:[#allocation9_spill]] }
  0x74   : > { %s4295_s26 = sld [smem:[#allocation18_spill]] }
  0x75   : > { %s4189_s3 = sld [smem:[#allocation2 + $0xe]] }
  0xdf   : > { %v1181_v7 = vpop.permute.xlu0 %1180  ;;  %v1185_v8 = vpop.permute.xlu1 %1184 }
  0xe0   : > { %v1192_v9 = vsel %vm1189_vm1, %v1170_v3, %v1185_v8  ;;  %v1190_v10 = vsel %vm1189_vm1, 0.0, %v1181_v7 }
  0xe1   : > { %v1209_v11 = vrot.slane %v1192_v9, 7  ;;  %v1206_v14 = vrot.slane %v1190_v10, 7 }
  0xe3   : > { %v1183_v12 = vpop.permute.xlu0 %1182 }
  0xe4   : > { %v1191_v13 = vsel %vm1189_vm1, %v1169_v2, %v1183_v12 }
  0xe5   : > { %v1207_v15 = vrot.slane %v1191_v13, 7 }
  0xe7   : > { %v1208_v16 = vsel %vm1205_vm2, %v1206_v14, %v1207_v15  ;;  %v1210_v17 = vsel %vm1205_vm2, %v1207_v15, %v1209_v11 }
  0xe8   : > { %3505 = vmatprep.mubr.msk.f32.mxu0 %vm1211_vm3, %v1208_v16 }
  0xe9   : > { %3506 = vmatmul.mubr.msk.f32.vlgmr.msra.gmra.mxu0 %vm1211_vm3, %v1210_v17 }
  0xea   : > { %3521 = vmatprep.mubr.msk.f32.mxu0 %vm1189_vm1, %v1169_v2  ;;  %3520 = vmatpush3.msra.mxu0 %v1421_v27 }
  0xeb   : > { %3524 = vmatprep.subr.mxu0 %v1541_v53 }
  0xed   : > { %3522 = vmatmul.mubr.msk.f32.vlgmr.msra.gmra.mxu0 %vm1189_vm1, %v1170_v3  ;;  %v1538_v3 = vld [vmem:[%s3820_s8] sm:$0xff] }
  0xee   : > { %3525 = vmatpush3.msra.mxu0 %v1541_v53  ;;  %v1759_v53 = vstv %s3357_s22  ;;  %s4288_s22 = sld [smem:[#allocation11_spill]] }
  0xef   : > { %3526 = vmatprep.subr.mxu0 %v1540_v59 }
  0xf0   : > { %3527 = vmatpush3.msra.mxu0 %v1540_v59 }
  0xf1   : > { %3528 = vmatprep.subr.mxu0 %v1539_v63 }
  0xf2   : > { %3529 = vmatpush3.msra.mxu0 %v1539_v63  ;;  %v1882_v63 = vld [vmem:[%s4283_s0 + $0x8] sm:$0xff] }
  0xf3   : > { %3530 = vmatprep.subr.mxu0 %v1538_v3 }
  0xf4   : > { %3531 = vmatpush3.msra.mxu0 %v1538_v3 }
  0xf5   : > { %3549 = vmatprep.subr.mxu0 %v1882_v63 }
 0x1a9   : > { %v3507_v21 = vpop.f32.mrf.mxu0 }
 0x1aa   : > { %v1288_v24 = vadd.f32 %v3507_v21, %v3347_v19 }
 0x1ab   : > { %v1282_v25 = vpop.f32.mrf.mxu0 }
 0x1ac   : > { %vm1292_vm4 = vcmp.gt.f32.partialorder %v1288_v24, 0.0  ;;  %v1295_v28 = vmul.f32 %v1293_v22, %v1288_v24  ;;  %v1283_v29 = vadd.f32 %v3347_v19, %v1282_v25 }
 0x1ad   : > { %v3523_v48 = vpop.f32.mrf.mxu0 }
 0x1ae   : > { %v1297_v30 = vsel %vm1292_vm4, %v1288_v24, %v1295_v28  ;;  %vm1291_vm5 = vcmp.gt.f32.partialorder %v1283_v29, 0.0  ;;  %v1294_v31 = vmul.f32 %v1293_v22, %v1283_v29  ;;  %v1505_v54 = vadd.f32 %v3523_v48, %v3353_v49  ;;  %v1662_v24 = vld [vmem:[%s3830_s19 + $0x8] sm:$0xff] }
 0x1af   : > { %v1301_v33 = vrot.slane %v1297_v30, 1  ;;  %v1499_v58 = vpop.f32.mrf.mxu0  ;;  %3535 = vmatprep.subr.mxu1 %v1662_v24 }
 0x1b0   : > { %v1296_v32 = vsel %vm1291_vm5, %v1283_v29, %v1294_v31  ;;  %v1500_v1 = vadd.f32 %v3353_v49, %v1499_v58  ;;  %v1661_v29 = vld [vmem:[%s3830_s19] sm:$0xff] }
 0x1b1   : > { %v1300_v34 = vrot.slane %v1296_v32, 1 }
 0x1b3   : > { %1303 = vrot.lane.b32.xlu1 %v1300_v34, %s4253_s7  ;;  %v1302_v35 = vsel %vm1176_vm0, %v1300_v34, %v1301_v33 }
 0x1b4   : > { %1305 = vrot.lane.b32.xlu0 %v1302_v35, %s4253_s7 }
 0x1b7   : > { %1307 = vrot.lane.b32.xlu1 %v1301_v33, %s4253_s7 }
 0x225   : > { %v1304_v36 = vpop.permute.xlu1 %1303 }
 0x226   : > { %v1312_v37 = vsel %vm1211_vm3, 0.0, %v1304_v36  ;;  %v1306_v38 = vpop.permute.xlu0 %1305 }
 0x227   : > { %v1329_v39 = vrot.slane %v1312_v37, 7  ;;  %v1313_v40 = vsel %vm1211_vm3, %v1296_v32, %v1306_v38 }
 0x228   : > { %v1330_v41 = vrot.slane %v1313_v40, 7 }
 0x229   : > { %v1308_v42 = vpop.permute.xlu1 %1307 }
 0x22a   : > { %v1314_v43 = vsel %vm1211_vm3, %v1297_v30, %v1308_v42  ;;  %v1331_v44 = vsel %vm1205_vm2, %v1329_v39, %v1330_v41  ;;  %v1765_v30 = vld [vmem:[%s3840_s30 + $0x8] sm:$0xff] }
 0x22b   : > { %v1332_v45 = vrot.slane %v1314_v43, 7  ;;  %3516 = vmatprep.mubr.msk.f32.mxu1 %vm1334_vm6, %v1331_v44 }
 0x22d   : > { %v1333_v46 = vsel %vm1205_vm2, %v1330_v41, %v1332_v45 }
 0x22e   : > { %3517 = vmatmul.mubr.msk.f32.vlgmr.msra.gmra.mxu1 %vm1334_vm6, %v1333_v46 }
 0x22f   : > { %3536 = vmatpush3.msra.mxu1 %v1662_v24 }
 0x230   : > { %3537 = vmatprep.subr.mxu1 %v1661_v29 }
 0x231   : > { %3538 = vmatpush3.msra.mxu1 %v1661_v29 }
 0x232   : > { %3542 = vmatprep.subr.mxu1 %v1765_v30 }
 0x2ee   : > { %v3518_v50 = vpop.f32.mrf.mxu1 }
 0x2ef   : > { %v1411_v52 = vadd.f32 %v3518_v50, %v3350_v47  ;;  %v1764_v50 = vld [vmem:[%s3840_s30] sm:$0xff] }
 0x2f0   : > { %v1405_v55 = vpop.f32.mrf.mxu1 }
 0x2f1   : > { %vm1415_vm7 = vcmp.gt.f32.partialorder %v1411_v52, 0.0  ;;  %v1418_v56 = vmul.f32 %v1416_v51, %v1411_v52  ;;  %v1406_v57 = vadd.f32 %v3350_v47, %v1405_v55 }
 0x2f3   : > { %v1420_v60 = vsel %vm1415_vm7, %v1411_v52, %v1418_v56  ;;  %vm1414_vm8 = vcmp.gt.f32.partialorder %v1406_v57, 0.0  ;;  %v1417_v62 = vmul.f32 %v1416_v51, %v1406_v57  ;;  %v3362_v51 = vld [vmem:[%s3835_s24] ss:$0 sm:$0xff] }
 0x2f4   : > { %v1509_v0 = vadd.f32 %v1505_v54, %v1420_v60  ;;  %v3365_v56 = vld [vmem:[%s3845_s6] ss:$0 sm:$0xff] }
 0x2f5   : > { %v1419_v2 = vsel %vm1414_vm8, %v1406_v57, %v1417_v62 }
 0x2f6   : > { %vm1511_vm9 = vcmp.gt.f32.partialorder %v1509_v0, 0.0  ;;  %v1514_v4 = vmul.f32 %v1512_v61, %v1509_v0  ;;  %v1508_v5 = vadd.f32 %v1500_v1, %v1419_v2 }
 0x2f8   : > { %v4039_v6 = vsel %vm1511_vm9, %v1509_v0, %v1514_v4  ;;  %vm1510_vm10 = vcmp.gt.f32.partialorder %v1508_v5, 0.0  ;;  %v1513_v7 = vmul.f32 %v1512_v61, %v1508_v5  ;;  %v1856_v0 = vstv %s3358_s23  ;;  %s4289_s23 = sld [smem:[#allocation12_spill]] }
 0x2f9   : > { %v1524_v10 = vrot.slane %v4039_v6, 2 }
 0x2fa   : > { %v4041_v8 = vsel %vm1510_vm10, %v1508_v5, %v1513_v7  ;;  %v1881_v5 = vld [vmem:[%s4283_s0] sm:$0xff]  ;;  %s4303_s0 = sld [smem:[#allocation24_spill]] }
 0x2fb   : > { %v1523_v9 = vrot.slane %v4041_v8, 2 }
 0x2fd   : > { %1526 = vrot.lane.b32.xlu0 %v1523_v9, %s4253_s7  ;;  %v1525_v11 = vsel %vm1522_vm11, %v1523_v9, %v1524_v10 }
 0x2fe   : > { %1528 = vrot.lane.b32.xlu1 %v1525_v11, %s4253_s7 }
 0x301   : > { %1530 = vrot.lane.b32.xlu0 %v1524_v10, %s4253_s7  ;;  %v2106_v10 = vld [vmem:[%s4284_s28] sm:$0xff]  ;;  %s3369_s28 = sld [smem:[#allocation2 + $0x7]] }
 0x36f   : > { %v1527_v12 = vpop.permute.xlu0 %1526 }
 0x370   : > { %v1535_v13 = vsel %vm1211_vm3, 0.0, %v1527_v12  ;;  %v1529_v14 = vpop.permute.xlu1 %1528 }
 0x371   : > { %v1553_v15 = vrot.slane %v1535_v13, 6  ;;  %v1536_v16 = vsel %vm1211_vm3, %v4041_v8, %v1529_v14 }
 0x372   : > { %v1554_v17 = vrot.slane %v1536_v16, 6 }
 0x373   : > { %v1531_v18 = vpop.permute.xlu0 %1530 }
 0x374   : > { %v1537_v19 = vsel %vm1211_vm3, %v4039_v6, %v1531_v18  ;;  %v1555_v20 = vsel %vm1552_vm12, %v1553_v15, %v1554_v17 }
 0x375   : > { %v1556_v21 = vrot.slane %v1537_v19, 6  ;;  %3532 = vmatprep.mubr.msk.f32.mxu0 %vm1334_vm6, %v1555_v20 }
 0x377   : > { %v1557_v22 = vsel %vm1552_vm12, %v1554_v17, %v1556_v21 }
 0x378   : > { %3533 = vmatmul.mubr.msk.f32.vlgmr.msra.gmra.mxu0 %vm1334_vm6, %v1557_v22 }
 0x379   : > { %3550 = vmatpush3.msra.mxu0 %v1882_v63 }
 0x37a   : > { %3551 = vmatprep.subr.mxu0 %v1881_v5 }
 0x37b   : > { %3552 = vmatpush3.msra.mxu0 %v1881_v5 }
 0x37c   : > { %3567 = vmatprep.subr.mxu0 %v2106_v10 }
 0x438   : > { %v3534_v25 = vpop.f32.mrf.mxu0 }
 0x439   : > { %v1634_v27 = vadd.f32 %v3534_v25, %v3359_v23 }
 0x43a   : > { %v1628_v28 = vpop.f32.mrf.mxu0 }
 0x43b   : > { %vm1638_vm13 = vcmp.gt.f32.partialorder %v1634_v27, 0.0  ;;  %v1641_v31 = vmul.f32 %v1639_v26, %v1634_v27  ;;  %v1629_v32 = vadd.f32 %v3359_v23, %v1628_v28  ;;  %v2003_v28 = vld [vmem:[%s4285_s2 + $0x10] sm:$0xff] }
 0x43d   : > { %v1643_v33 = vsel %vm1638_vm13, %v1634_v27, %v1641_v31  ;;  %vm1637_vm14 = vcmp.gt.f32.partialorder %v1629_v32, 0.0  ;;  %v1640_v34 = vmul.f32 %v1639_v26, %v1629_v32  ;;  %v2004_v26 = vld [vmem:[%s4285_s2 + $0x18] sm:$0xff]  ;;  %v3371_v27 = vld [vmem:[%s4286_s10] ss:$0 sm:$0xff]  ;;  %v2002_v31 = vld [vmem:[%s4285_s2 + $0x8] sm:$0xff]  ;;  %s4112_s10 = sld [smem:[#allocation2 + $0x8]] }
 0x43e   : > { %v1647_v36 = vrot.slane %v1643_v33, 2 }
 0x43f   : > { %v1642_v35 = vsel %vm1637_vm14, %v1629_v32, %v1640_v34  ;;  %v2001_v34 = vld [vmem:[%s4285_s2] sm:$0xff]  ;;  %s3393_s2 = sld [smem:[#allocation2 + $0xd]] }
 0x440   : > { %v1646_v37 = vrot.slane %v1642_v35, 2 }
 0x442   : > { %1649 = vrot.lane.b32.xlu1 %v1646_v37, %s4255_s1  ;;  %v1648_v38 = vsel %vm1522_vm11, %v1646_v37, %v1647_v36 }
 0x443   : > { %1651 = vrot.lane.b32.xlu0 %v1648_v38, %s4255_s1 }
 0x446   : > { %1653 = vrot.lane.b32.xlu1 %v1647_v36, %s4255_s1 }
 0x4b4   : > { %v1650_v39 = vpop.permute.xlu1 %1649 }
 0x4b5   : > { %v1658_v40 = vsel %vm1189_vm1, 0.0, %v1650_v39  ;;  %v1652_v41 = vpop.permute.xlu0 %1651 }
 0x4b6   : > { %v1673_v42 = vrot.slane %v1658_v40, 6  ;;  %v1659_v43 = vsel %vm1189_vm1, %v1642_v35, %v1652_v41 }
 0x4b7   : > { %v1674_v44 = vrot.slane %v1659_v43, 6 }
 0x4b8   : > { %v1654_v45 = vpop.permute.xlu1 %1653 }
 0x4b9   : > { %v1660_v46 = vsel %vm1189_vm1, %v1643_v33, %v1654_v45  ;;  %v1675_v47 = vsel %vm1552_vm12, %v1673_v42, %v1674_v44 }
 0x4ba   : > { %v1676_v48 = vrot.slane %v1660_v46, 6  ;;  %3539 = vmatprep.mubr.msk.f32.mxu1 %vm1211_vm3, %v1675_v47 }
 0x4bc   : > { %v1677_v49 = vsel %vm1552_vm12, %v1674_v44, %v1676_v48 }
 0x4bd   : > { %3540 = vmatmul.mubr.msk.f32.vlgmr.msra.gmra.mxu1 %vm1211_vm3, %v1677_v49 }
 0x4be   : > { %3543 = vmatpush3.msra.mxu1 %v1765_v30  ;;  %3546 = vmatprep.mubr.msk.f32.mxu1 %vm1211_vm3, %v4041_v8  ;;  %v1979_v30 = vstv %s3368_s11  ;;  %s4290_s11 = sld [smem:[#allocation13_spill]] }
 0x4bf   : > { %3544 = vmatprep.subr.mxu1 %v1764_v50 }
 0x4c0   : > { %3545 = vmatpush3.msra.mxu1 %v1764_v50 }
 0x4c1   : > { %3547 = vmatmul.mubr.msk.f32.vlgmr.msra.gmra.mxu1 %vm1211_vm3, %v4039_v6  ;;  %3556 = vmatprep.subr.mxu1 %v2004_v26 }
 0x4c2   : > { %3557 = vmatpush3.msra.mxu1 %v2004_v26 }
 0x4c3   : > { %3558 = vmatprep.subr.mxu1 %v2003_v28 }
 0x4c4   : > { %3559 = vmatpush3.msra.mxu1 %v2003_v28 }
 0x4c5   : > { %3560 = vmatprep.subr.mxu1 %v2002_v31 }
 0x4c6   : > { %3561 = vmatpush3.msra.mxu1 %v2002_v31 }
 0x4c7   : > { %3562 = vmatprep.subr.mxu1 %v2001_v34 }
 0x4c8   : > { %3563 = vmatpush3.msra.mxu1 %v2001_v34 }
 0x57d   : > { %v3541_v52 = vpop.f32.mrf.mxu1 }
 0x57e   : > { %v1754_v54 = vadd.f32 %v3541_v52, %v3362_v51 }
 0x57f   : > { %v1748_v55 = vpop.f32.mrf.mxu1 }
 0x580   : > { %vm1758_vm15 = vcmp.gt.f32.partialorder %v1754_v54, 0.0  ;;  %v1761_v57 = vmul.f32 %v1759_v53, %v1754_v54  ;;  %v1749_v58 = vadd.f32 %v3362_v51, %v1748_v55 }
 0x581   : > { %v3548_v59 = vpop.f32.mrf.mxu1 }
 0x582   : > { %vm1757_vm4 = vcmp.gt.f32.partialorder %v1749_v58, 0.0  ;;  %v1760_v60 = vmul.f32 %v1759_v53, %v1749_v58  ;;  %v1763_v61 = vsel %vm1758_vm15, %v1754_v54, %v1761_v57  ;;  %v1849_v62 = vadd.f32 %v3548_v59, %v3365_v56  ;;  %v3374_v54 = vld [vmem:[%s4287_s18] ss:$0 sm:$0xff]  ;;  %s4291_s18 = sld [smem:[#allocation14_spill]] }
 0x583   : > { %v1843_v1 = vpop.f32.mrf.mxu1  ;;  %v2101_v57 = vstv %s3369_s28  ;;  %s3380_s28 = sld [smem:[#allocation2 + $0x9]] }
 0x584   : > { %v1853_v2 = vadd.f32 %v1849_v62, %v1763_v61  ;;  %v1762_v3 = vsel %vm1757_vm4, %v1749_v58, %v1760_v60  ;;  %v1844_v4 = vadd.f32 %v3365_v56, %v1843_v1  ;;  %v3377_v58 = vld [vmem:[%s4288_s22] ss:$0 sm:$0xff]  ;;  %v2225_v60 = vld [vmem:[%s4289_s23 + $0x18] sm:$0xff]  ;;  %v2224_v1 = vld [vmem:[%s4289_s23 + $0x10] sm:$0xff]  ;;  %s4292_s22 = sld [smem:[#allocation16_spill]] }
 0x586   : > { %vm1855_vm5 = vcmp.gt.f32.partialorder %v1853_v2, 0.0  ;;  %v1858_v6 = vmul.f32 %v1856_v0, %v1853_v2  ;;  %v1852_v7 = vadd.f32 %v1844_v4, %v1762_v3  ;;  %v2197_v4 = vstv %s4112_s10  ;;  %s4293_s10 = sld [smem:[#allocation15_spill]] }
 0x588   : > { %v1860_v8 = vsel %vm1855_vm5, %v1853_v2, %v1858_v6  ;;  %vm1854_vm7 = vcmp.gt.f32.partialorder %v1852_v7, 0.0  ;;  %v1857_v9 = vmul.f32 %v1856_v0, %v1852_v7  ;;  %v2223_v6 = vld [vmem:[%s4289_s23 + $0x8] sm:$0xff] }
 0x589   : > { %v1867_v13 = vrot.slane %v1860_v8, 1  ;;  %v2345_v31 = vld [vmem:[%s4291_s18 + $0x8] sm:$0xff] }
 0x58a   : > { %v1859_v11 = vsel %vm1854_vm7, %v1852_v7, %v1857_v9  ;;  %3583 = vmatprep.subr.mxu1 %v2345_v31 }
 0x58b   : > { %v1866_v12 = vrot.slane %v1859_v11, 1 }
 0x58d   : > { %1869 = vrot.lane.b32.xlu0 %v1866_v12, %s4255_s1  ;;  %v1868_v14 = vsel %vm1176_vm0, %v1866_v12, %v1867_v13 }
 0x58e   : > { %1871 = vrot.lane.b32.xlu1 %v1868_v14, %s4255_s1 }
 0x591   : > { %1873 = vrot.lane.b32.xlu0 %v1867_v13, %s4255_s1 }
 0x5ff   : > { %v1870_v15 = vpop.permute.xlu0 %1869 }
 0x600   : > { %v1878_v16 = vsel %vm1189_vm1, 0.0, %v1870_v15  ;;  %v1872_v17 = vpop.permute.xlu1 %1871 }
 0x601   : > { %v1893_v18 = vrot.slane %v1878_v16, 7  ;;  %v1879_v19 = vsel %vm1189_vm1, %v1859_v11, %v1872_v17 }
 0x602   : > { %v1894_v20 = vrot.slane %v1879_v19, 7 }
 0x603   : > { %v1874_v21 = vpop.permute.xlu0 %1873 }
 0x604   : > { %v1880_v22 = vsel %vm1189_vm1, %v1860_v8, %v1874_v21  ;;  %v1895_v23 = vsel %vm1205_vm2, %v1893_v18, %v1894_v20 }
 0x605   : > { %v1896_v24 = vrot.slane %v1880_v22, 7  ;;  %3553 = vmatprep.mubr.msk.f32.mxu0 %vm1211_vm3, %v1895_v23 }
 0x607   : > { %v1897_v25 = vsel %vm1205_vm2, %v1894_v20, %v1896_v24 }
 0x608   : > { %3554 = vmatmul.mubr.msk.f32.vlgmr.msra.gmra.mxu0 %vm1211_vm3, %v1897_v25 }
 0x609   : > { %3569 = vmatprep.mubr.msk.f32.mxu0 %vm1189_vm1, %v1859_v11  ;;  %3568 = vmatpush3.msra.mxu0 %v2106_v10  ;;  %v2222_v10 = vld [vmem:[%s4289_s23] sm:$0xff] }
 0x60a   : > { %3572 = vmatprep.subr.mxu0 %v2225_v60 }
 0x60c   : > { %3570 = vmatmul.mubr.msk.f32.vlgmr.msra.gmra.mxu0 %vm1189_vm1, %v1860_v8 }
 0x60d   : > { %3573 = vmatpush3.msra.mxu0 %v2225_v60 }
 0x60e   : > { %3574 = vmatprep.subr.mxu0 %v2224_v1 }
 0x60f   : > { %3575 = vmatpush3.msra.mxu0 %v2224_v1 }
 0x610   : > { %3576 = vmatprep.subr.mxu0 %v2223_v6 }
 0x611   : > { %3577 = vmatpush3.msra.mxu0 %v2223_v6  ;;  %v2565_v6 = vld [vmem:[%s4295_s26 + $0x8] sm:$0xff] }
 0x612   : > { %3578 = vmatprep.subr.mxu0 %v2222_v10 }
 0x613   : > { %3579 = vmatpush3.msra.mxu0 %v2222_v10 }
 0x614   : > { %3597 = vmatprep.subr.mxu0 %v2565_v6 }
 0x6c8   : > { %v3555_v29 = vpop.f32.mrf.mxu0 }
 0x6c9   : > { %v1974_v32 = vadd.f32 %v3555_v29, %v3371_v27 }
 0x6ca   : > { %v1968_v33 = vpop.f32.mrf.mxu0 }
 0x6cb   : > { %vm1978_vm8 = vcmp.gt.f32.partialorder %v1974_v32, 0.0  ;;  %v1981_v35 = vmul.f32 %v1979_v30, %v1974_v32  ;;  %v1969_v36 = vadd.f32 %v3371_v27, %v1968_v33  ;;  %v2322_v33 = vstv %s3380_s28  ;;  %s3381_s28 = sld [smem:[#allocation2 + $0xa]] }
 0x6cc   : > { %v3571_v55 = vpop.f32.mrf.mxu0 }
 0x6cd   : > { %v1983_v37 = vsel %vm1978_vm8, %v1974_v32, %v1981_v35  ;;  %vm1977_vm9 = vcmp.gt.f32.partialorder %v1969_v36, 0.0  ;;  %v1980_v38 = vmul.f32 %v1979_v30, %v1969_v36  ;;  %v2190_v2 = vadd.f32 %v3571_v55, %v3377_v58  ;;  %v3383_v30 = vld [vmem:[%s4290_s11] ss:$0 sm:$0xff]  ;;  %s4294_s11 = sld [smem:[#allocation17_spill]] }
 0x6ce   : > { %v1987_v40 = vrot.slane %v1983_v37, 1  ;;  %v2184_v62 = vpop.f32.mrf.mxu0 }
 0x6cf   : > { %v1982_v39 = vsel %vm1977_vm9, %v1969_v36, %v1980_v38  ;;  %v2185_v7 = vadd.f32 %v3377_v58, %v2184_v62  ;;  %v2344_v36 = vld [vmem:[%s4291_s18] sm:$0xff] }
 0x6d0   : > { %v1986_v41 = vrot.slane %v1982_v39, 1  ;;  %v3386_v58 = vld [vmem:[%s4293_s10] ss:$0 sm:$0xff]  ;;  %s4298_s10 = sld [smem:[#allocation20_spill]] }
 0x6d1   : > { %v2442_v60 = vstv %s3381_s28  ;;  %s4300_s28 = smov 16  }
 0x6d2   : > { %1989 = vrot.lane.b32.xlu1 %v1986_v41, %s4253_s7  ;;  %v1988_v42 = vsel %vm1176_vm0, %v1986_v41, %v1987_v40 }
 0x6d3   : > { %1991 = vrot.lane.b32.xlu0 %v1988_v42, %s4253_s7 }
 0x6d6   : > { %1993 = vrot.lane.b32.xlu1 %v1987_v40, %s4253_s7 }
 0x744   : > { %v1990_v43 = vpop.permute.xlu1 %1989 }
 0x745   : > { %v1998_v44 = vsel %vm1211_vm3, 0.0, %v1990_v43  ;;  %v1992_v45 = vpop.permute.xlu0 %1991 }
 0x746   : > { %v2015_v46 = vrot.slane %v1998_v44, 7  ;;  %v1999_v47 = vsel %vm1211_vm3, %v1982_v39, %v1992_v45 }
 0x747   : > { %v2016_v48 = vrot.slane %v1999_v47, 7 }
 0x748   : > { %v1994_v49 = vpop.permute.xlu1 %1993 }
 0x749   : > { %v2000_v50 = vsel %vm1211_vm3, %v1983_v37, %v1994_v49  ;;  %v2017_v51 = vsel %vm1205_vm2, %v2015_v46, %v2016_v48  ;;  %v2448_v37 = vld [vmem:[%s4292_s22 + $0x8] sm:$0xff] }
 0x74a   : > { %v2018_v52 = vrot.slane %v2000_v50, 7  ;;  %3564 = vmatprep.mubr.msk.f32.mxu1 %vm1334_vm6, %v2017_v51 }
 0x74c   : > { %v2019_v53 = vsel %vm1205_vm2, %v2016_v48, %v2018_v52 }
 0x74d   : > { %3565 = vmatmul.mubr.msk.f32.vlgmr.msra.gmra.mxu1 %vm1334_vm6, %v2019_v53 }
 0x74e   : > { %3584 = vmatpush3.msra.mxu1 %v2345_v31 }
 0x74f   : > { %3585 = vmatprep.subr.mxu1 %v2344_v36 }
 0x750   : > { %3586 = vmatpush3.msra.mxu1 %v2344_v36 }
 0x751   : > { %3590 = vmatprep.subr.mxu1 %v2448_v37 }
 0x80d   : > { %v3566_v56 = vpop.f32.mrf.mxu1 }
 0x80e   : > { %v2096_v59 = vadd.f32 %v3566_v56, %v3374_v54 }
 0x80f   : > { %v2090_v61 = vpop.f32.mrf.mxu1 }
 0x810   : > { %vm2100_vm10 = vcmp.gt.f32.partialorder %v2096_v59, 0.0  ;;  %v2103_v63 = vmul.f32 %v2101_v57, %v2096_v59  ;;  %v2091_v0 = vadd.f32 %v3374_v54, %v2090_v61 }
 0x812   : > { %v2105_v3 = vsel %vm2100_vm10, %v2096_v59, %v2103_v63  ;;  %vm2099_vm13 = vcmp.gt.f32.partialorder %v2091_v0, 0.0  ;;  %v2102_v5 = vmul.f32 %v2101_v57, %v2091_v0  ;;  %v2447_v57 = vld [vmem:[%s4292_s22] sm:$0xff] }
 0x813   : > { %v2194_v8 = vadd.f32 %v2190_v2, %v2105_v3  ;;  %v3389_v63 = vld [vmem:[%s4294_s11] ss:$0 sm:$0xff]  ;;  %s3392_s11 = sld [smem:[#allocation2 + $0xc]] }
 0x814   : > { %v2104_v9 = vsel %vm2099_vm13, %v2091_v0, %v2102_v5 }
 0x815   : > { %vm2196_vm14 = vcmp.gt.f32.partialorder %v2194_v8, 0.0  ;;  %v2199_v11 = vmul.f32 %v2197_v4, %v2194_v8  ;;  %v2193_v12 = vadd.f32 %v2185_v7, %v2104_v9 }
 0x817   : > { %v2198_v13 = vmul.f32 %v2197_v4, %v2193_v12  ;;  %vm2195_vm15 = vcmp.gt.f32.partialorder %v2193_v12, 0.0  ;;  %v4121_v14 = vsel %vm2196_vm14, %v2194_v8, %v2199_v11 }
 0x818   : > { %v2208_v17 = vrot.slane %v4121_v14, 2 }
 0x819   : > { %v2200_v15 = vsel %vm2195_vm15, %v2193_v12, %v2198_v13  ;;  %v2564_v12 = vld [vmem:[%s4295_s26] sm:$0xff] }
 0x81a   : > { %v2207_v16 = vrot.slane %v2200_v15, 2 }
 0x81c   : > { %2210 = vrot.lane.b32.xlu0 %v2207_v16, %s4253_s7  ;;  %v2209_v18 = vsel %vm1522_vm11, %v2207_v16, %v2208_v17 }
 0x81d   : > { %2212 = vrot.lane.b32.xlu1 %v2209_v18, %s4253_s7 }
 0x820   : > { %2214 = vrot.lane.b32.xlu0 %v2208_v17, %s4253_s7  ;;  %s3382_s7 = sld [smem:[#allocation2 + $0xb]] }
 0x826   : > { %v2539_v7 = vstv %s3382_s7  ;;  %s4297_s7 = smov 8  }
 0x88e   : > { %v2211_v19 = vpop.permute.xlu0 %2210 }
 0x88f   : > { %v2219_v20 = vsel %vm1211_vm3, 0.0, %v2211_v19  ;;  %v2213_v21 = vpop.permute.xlu1 %2212 }
 0x890   : > { %v2236_v22 = vrot.slane %v2219_v20, 6  ;;  %v2220_v23 = vsel %vm1211_vm3, %v2200_v15, %v2213_v21 }
 0x891   : > { %v2237_v24 = vrot.slane %v2220_v23, 6 }
 0x892   : > { %v2215_v25 = vpop.permute.xlu0 %2214 }
 0x893   : > { %v2221_v26 = vsel %vm1211_vm3, %v4121_v14, %v2215_v25  ;;  %v2238_v27 = vsel %vm1552_vm12, %v2236_v22, %v2237_v24 }
 0x894   : > { %v2239_v28 = vrot.slane %v2221_v26, 6  ;;  %3580 = vmatprep.mubr.msk.f32.mxu0 %vm1334_vm6, %v2238_v27 }
 0x896   : > { %v2240_v29 = vsel %vm1552_vm12, %v2237_v24, %v2239_v28 }
 0x897   : > { %3581 = vmatmul.mubr.msk.f32.vlgmr.msra.gmra.mxu0 %vm1334_vm6, %v2240_v29 }
 0x898   : > { %3598 = vmatpush3.msra.mxu0 %v2565_v6 }
 0x899   : > { %3599 = vmatprep.subr.mxu0 %v2564_v12 }
 0x89a   : > { %3600 = vmatpush3.msra.mxu0 %v2564_v12 }
 0x957   : > { %v3582_v32 = vpop.f32.mrf.mxu0 }
 0x958   : > { %v2317_v34 = vadd.f32 %v3582_v32, %v3383_v30 }
 0x959   : > { %v2311_v35 = vpop.f32.mrf.mxu0 }
 0x95a   : > { %vm2321_vm4 = vcmp.gt.f32.partialorder %v2317_v34, 0.0  ;;  %v2324_v38 = vmul.f32 %v2322_v33, %v2317_v34  ;;  %v2312_v39 = vadd.f32 %v3383_v30, %v2311_v35  ;;  %v2686_v35 = vld [vmem:[%s4298_s10 + $0x10] sm:$0xff] }
 0x95c   : > { %v2326_v40 = vsel %vm2321_vm4, %v2317_v34, %v2324_v38  ;;  %vm2320_vm5 = vcmp.gt.f32.partialorder %v2312_v39, 0.0  ;;  %v2323_v41 = vmul.f32 %v2322_v33, %v2312_v39  ;;  %v2687_v33 = vld [vmem:[%s4298_s10 + $0x18] sm:$0xff]  ;;  %v2685_v38 = vld [vmem:[%s4298_s10 + $0x8] sm:$0xff] }
 0x95d   : > { %v2330_v43 = vrot.slane %v2326_v40, 2 }
 0x95e   : > { %v2325_v42 = vsel %vm2320_vm5, %v2312_v39, %v2323_v41  ;;  %v2684_v41 = vld [vmem:[%s4298_s10] sm:$0xff] }
 0x95f   : > { %v2329_v44 = vrot.slane %v2325_v42, 2 }
 0x961   : > { %2332 = vrot.lane.b32.xlu1 %v2329_v44, %s4255_s1  ;;  %v2331_v45 = vsel %vm1522_vm11, %v2329_v44, %v2330_v43 }
 0x962   : > { %2334 = vrot.lane.b32.xlu0 %v2331_v45, %s4255_s1 }
 0x965   : > { %2336 = vrot.lane.b32.xlu1 %v2330_v43, %s4255_s1  ;;  %s4296_s1 = sld [smem:[#allocation22_spill]] }
 0x96b   : > { %v2789_v17 = vld [vmem:[%s4296_s1] sm:$0xff]  ;;  %s4299_s1 = sld [smem:[#allocation19_spill]] }
 0x96c   : > { %3615 = vmatprep.subr.mxu0 %v2789_v17 }
 0x971   : > { %v3395_v34 = vld [vmem:[%s4299_s1] ss:$0 sm:$0xff]  ;;  %s4301_s1 = sld [smem:[#allocation21_spill]] }
 0x9d3   : > { %v2333_v46 = vpop.permute.xlu1 %2332 }
 0x9d4   : > { %v2341_v47 = vsel %vm1189_vm1, 0.0, %v2333_v46  ;;  %v2335_v48 = vpop.permute.xlu0 %2334 }
 0x9d5   : > { %v2356_v49 = vrot.slane %v2341_v47, 6  ;;  %v2342_v50 = vsel %vm1189_vm1, %v2325_v42, %v2335_v48 }
 0x9d6   : > { %v2357_v51 = vrot.slane %v2342_v50, 6 }
 0x9d7   : > { %v2337_v52 = vpop.permute.xlu1 %2336 }
 0x9d8   : > { %v2343_v53 = vsel %vm1189_vm1, %v2326_v40, %v2337_v52  ;;  %v2358_v54 = vsel %vm1552_vm12, %v2356_v49, %v2357_v51 }
 0x9d9   : > { %v2359_v55 = vrot.slane %v2343_v53, 6  ;;  %3587 = vmatprep.mubr.msk.f32.mxu1 %vm1211_vm3, %v2358_v54 }
 0x9db   : > { %v2360_v56 = vsel %vm1552_vm12, %v2357_v51, %v2359_v55 }
 0x9dc   : > { %3588 = vmatmul.mubr.msk.f32.vlgmr.msra.gmra.mxu1 %vm1211_vm3, %v2360_v56 }
 0x9dd   : > { %3591 = vmatpush3.msra.mxu1 %v2448_v37  ;;  %3594 = vmatprep.mubr.msk.f32.mxu1 %vm1211_vm3, %v2200_v15  ;;  %v2662_v37 = vstv %s3392_s11  ;;  %s4302_s11 = sld [smem:[#allocation23_spill]] }
 0x9de   : > { %3592 = vmatprep.subr.mxu1 %v2447_v57 }
 0x9df   : > { %3593 = vmatpush3.msra.mxu1 %v2447_v57 }
 0x9e0   : > { %3595 = vmatmul.mubr.msk.f32.vlgmr.msra.gmra.mxu1 %vm1211_vm3, %v4121_v14  ;;  %3604 = vmatprep.subr.mxu1 %v2687_v33 }
 0x9e1   : > { %3605 = vmatpush3.msra.mxu1 %v2687_v33 }
 0x9e2   : > { %3606 = vmatprep.subr.mxu1 %v2686_v35 }
 0x9e3   : > { %3607 = vmatpush3.msra.mxu1 %v2686_v35 }
 0x9e4   : > { %3608 = vmatprep.subr.mxu1 %v2685_v38 }
 0x9e5   : > { %3609 = vmatpush3.msra.mxu1 %v2685_v38 }
 0x9e6   : > { %3610 = vmatprep.subr.mxu1 %v2684_v41 }
 0x9e7   : > { %3611 = vmatpush3.msra.mxu1 %v2684_v41 }
 0xa9c   : > { %v3589_v59 = vpop.f32.mrf.mxu1 }
 0xa9d   : > { %v2437_v61 = vadd.f32 %v3589_v59, %v3386_v58 }
 0xa9e   : > { %v2431_v62 = vpop.f32.mrf.mxu1 }
 0xa9f   : > { %vm2441_vm7 = vcmp.gt.f32.partialorder %v2437_v61, 0.0  ;;  %v2444_v0 = vmul.f32 %v2442_v60, %v2437_v61  ;;  %v2432_v1 = vadd.f32 %v3386_v58, %v2431_v62 }
 0xaa0   : > { %v3596_v2 = vpop.f32.mrf.mxu1 }
 0xaa1   : > { %vm2440_vm8 = vcmp.gt.f32.partialorder %v2432_v1, 0.0  ;;  %v2443_v3 = vmul.f32 %v2442_v60, %v2432_v1  ;;  %v2446_v4 = vsel %vm2441_vm7, %v2437_v61, %v2444_v0  ;;  %v2532_v5 = vadd.f32 %v3596_v2, %v3389_v63  ;;  %v3398_v61 = vld [vmem:[%s4301_s1] ss:$0 sm:$0xff]  ;;  %s3406_s1 = sld [smem:[#allocation2 + $0x11]] }
 0xaa2   : > { %v2526_v8 = vpop.f32.mrf.mxu1  ;;  %v2784_v0 = vstv %s3393_s2  ;;  %s4305_s2 = sld [smem:[#allocation26_spill]] }
 0xaa3   : > { %v2536_v9 = vadd.f32 %v2532_v5, %v2446_v4  ;;  %v2445_v10 = vsel %vm2440_vm8, %v2432_v1, %v2443_v3  ;;  %v2527_v11 = vadd.f32 %v3389_v63, %v2526_v8  ;;  %v3401_v1 = vld [vmem:[%s4302_s11] ss:$0 sm:$0xff]  ;;  %v2908_v3 = vld [vmem:[%s4303_s0 + $0x18] sm:$0xff]  ;;  %v2907_v8 = vld [vmem:[%s4303_s0 + $0x10] sm:$0xff]  ;;  %s4306_s11 = sshll.u32 %s4308_s16, 4 }
 0xaa5   : > { %vm2538_vm9 = vcmp.gt.f32.partialorder %v2536_v9, 0.0  ;;  %v2541_v13 = vmul.f32 %v2539_v7, %v2536_v9  ;;  %v2535_v14 = vadd.f32 %v2527_v11, %v2445_v10  ;;  %v2880_v11 = vstv %s4189_s3  ;;  %s4304_s3 = sld [smem:[#allocation25_spill]] }
 0xaa7   : > { %v2543_v15 = vsel %vm2538_vm9, %v2536_v9, %v2541_v13  ;;  %vm2537_vm10 = vcmp.gt.f32.partialorder %v2535_v14, 0.0  ;;  %v2540_v16 = vmul.f32 %v2539_v7, %v2535_v14  ;;  %v2906_v13 = vld [vmem:[%s4303_s0 + $0x8] sm:$0xff] }
 0xaa8   : > { %v2550_v20 = vrot.slane %v2543_v15, 1  ;;  %v3028_v38 = vld [vmem:[%s4305_s2 + $0x8] sm:$0xff] }
 0xaa9   : > { %v2542_v18 = vsel %vm2537_vm10, %v2535_v14, %v2540_v16  ;;  %3631 = vmatprep.subr.mxu1 %v3028_v38 }
 0xaaa   : > { %v2549_v19 = vrot.slane %v2542_v18, 1 }
 0xaac   : > { %2552 = vrot.lane.b32.xlu0 %v2549_v19, %s4297_s7  ;;  %v2551_v21 = vsel %vm1176_vm0, %v2549_v19, %v2550_v20 }
 0xaad   : > { %2554 = vrot.lane.b32.xlu1 %v2551_v21, %s4297_s7 }
 0xab0   : > { %2556 = vrot.lane.b32.xlu0 %v2550_v20, %s4297_s7 }
 0xb1e   : > { %v2553_v22 = vpop.permute.xlu0 %2552 }
 0xb1f   : > { %v2561_v23 = vsel %vm1189_vm1, 0.0, %v2553_v22  ;;  %v2555_v24 = vpop.permute.xlu1 %2554 }
 0xb20   : > { %v2576_v25 = vrot.slane %v2561_v23, 7  ;;  %v2562_v26 = vsel %vm1189_vm1, %v2542_v18, %v2555_v24 }
 0xb21   : > { %v2577_v27 = vrot.slane %v2562_v26, 7 }
 0xb22   : > { %v2557_v28 = vpop.permute.xlu0 %2556 }
 0xb23   : > { %v2563_v29 = vsel %vm1189_vm1, %v2543_v15, %v2557_v28  ;;  %v2578_v30 = vsel %vm1205_vm2, %v2576_v25, %v2577_v27 }
 0xb24   : > { %v2579_v31 = vrot.slane %v2563_v29, 7  ;;  %3601 = vmatprep.mubr.msk.f32.mxu0 %vm1211_vm3, %v2578_v30 }
 0xb26   : > { %v2580_v32 = vsel %vm1205_vm2, %v2577_v27, %v2579_v31 }
 0xb27   : > { %3602 = vmatmul.mubr.msk.f32.vlgmr.msra.gmra.mxu0 %vm1211_vm3, %v2580_v32 }
 0xb28   : > { %3617 = vmatprep.mubr.msk.f32.mxu0 %vm1189_vm1, %v2542_v18  ;;  %3616 = vmatpush3.msra.mxu0 %v2789_v17  ;;  %v2905_v17 = vld [vmem:[%s4303_s0] sm:$0xff] }
 0xb29   : > { %3620 = vmatprep.subr.mxu0 %v2908_v3 }
 0xb2b   : > { %3618 = vmatmul.mubr.msk.f32.vlgmr.msra.gmra.mxu0 %vm1189_vm1, %v2543_v15 }
 0xb2c   : > { %3621 = vmatpush3.msra.mxu0 %v2908_v3 }
 0xb2d   : > { %3622 = vmatprep.subr.mxu0 %v2907_v8 }
 0xb2e   : > { %3623 = vmatpush3.msra.mxu0 %v2907_v8 }
 0xb2f   : > { %3624 = vmatprep.subr.mxu0 %v2906_v13 }
 0xb30   : > { %3625 = vmatpush3.msra.mxu0 %v2906_v13  ;;  %v3222_v13 = vstv %s3406_s1 }
 0xb31   : > { %3626 = vmatprep.subr.mxu0 %v2905_v17 }
 0xb32   : > { %3627 = vmatpush3.msra.mxu0 %v2905_v17 }
 0xbe7   : > { %v3603_v36 = vpop.f32.mrf.mxu0 }
 0xbe8   : > { %v2657_v39 = vadd.f32 %v3603_v36, %v3395_v34 }
 0xbe9   : > { %v2651_v40 = vpop.f32.mrf.mxu0 }
 0xbea   : > { %vm2661_vm13 = vcmp.gt.f32.partialorder %v2657_v39, 0.0  ;;  %v2664_v42 = vmul.f32 %v2662_v37, %v2657_v39  ;;  %v2652_v43 = vadd.f32 %v3395_v34, %v2651_v40 }
 0xbeb   : > { %v3619_v62 = vpop.f32.mrf.mxu0 }
 0xbec   : > { %v2666_v44 = vsel %vm2661_vm13, %v2657_v39, %v2664_v42  ;;  %vm2660_vm14 = vcmp.gt.f32.partialorder %v2652_v43, 0.0  ;;  %v2663_v45 = vmul.f32 %v2662_v37, %v2652_v43  ;;  %v2873_v9 = vadd.f32 %v3619_v62, %v3401_v1  ;;  %v3407_v37 = vld [vmem:[%s4304_s3] ss:$0 sm:$0xff]  ;;  %s1168_s3 = scalar_lea.vmem %s3970_s12, %s4306_s11 }
 0xbed   : > { %v2670_v47 = vrot.slane %v2666_v44, 1  ;;  %v2867_v5 = vpop.f32.mrf.mxu0 }
 0xbee   : > { %v2665_v46 = vsel %vm2660_vm14, %v2652_v43, %v2663_v45  ;;  %v2868_v14 = vadd.f32 %v3401_v1, %v2867_v5  ;;  %v3027_v43 = vld [vmem:[%s4305_s2] sm:$0xff] }
 0xbef   : > { %v2669_v48 = vrot.slane %v2665_v46, 1  ;;  %v3410_v1 = vld [vmem:[%s3955_s20] ss:$0 sm:$0xff] }
 0xbf1   : > { %2672 = vrot.lane.b32.xlu1 %v2669_v48, %s4300_s28  ;;  %v2671_v49 = vsel %vm1176_vm0, %v2669_v48, %v2670_v47 }
 0xbf2   : > { %2674 = vrot.lane.b32.xlu0 %v2671_v49, %s4300_s28 }
 0xbf5   : > { %2676 = vrot.lane.b32.xlu1 %v2670_v47, %s4300_s28 }
 0xc63   : > { %v2673_v50 = vpop.permute.xlu1 %2672 }
 0xc64   : > { %v2681_v51 = vsel %vm1211_vm3, 0.0, %v2673_v50  ;;  %v2675_v52 = vpop.permute.xlu0 %2674 }
 0xc65   : > { %v2698_v53 = vrot.slane %v2681_v51, 7  ;;  %v2682_v54 = vsel %vm1211_vm3, %v2665_v46, %v2675_v52 }
 0xc66   : > { %v2699_v55 = vrot.slane %v2682_v54, 7 }
 0xc67   : > { %v2677_v56 = vpop.permute.xlu1 %2676 }
 0xc68   : > { %v2683_v57 = vsel %vm1211_vm3, %v2666_v44, %v2677_v56  ;;  %v2700_v58 = vsel %vm1205_vm2, %v2698_v53, %v2699_v55  ;;  %v3131_v44 = vld [vmem:[%s3960_s27 + $0x8] sm:$0xff] }
 0xc69   : > { %v2701_v59 = vrot.slane %v2683_v57, 7  ;;  %3612 = vmatprep.mubr.msk.f32.mxu1 %vm1334_vm6, %v2700_v58 }
 0xc6b   : > { %v2702_v60 = vsel %vm1205_vm2, %v2699_v55, %v2701_v59 }
 0xc6c   : > { %3613 = vmatmul.mubr.msk.f32.vlgmr.msra.gmra.mxu1 %vm1334_vm6, %v2702_v60 }
 0xc6d   : > { %3632 = vmatpush3.msra.mxu1 %v3028_v38 }
 0xc6e   : > { %3633 = vmatprep.subr.mxu1 %v3027_v43 }
 0xc6f   : > { %3634 = vmatpush3.msra.mxu1 %v3027_v43 }
 0xc70   : > { %3638 = vmatprep.subr.mxu1 %v3131_v44 }
 0xd2c   : > { %v3614_v63 = vpop.f32.mrf.mxu1 }
 0xd2d   : > { %v2779_v2 = vadd.f32 %v3614_v63, %v3398_v61 }
 0xd2e   : > { %v2773_v4 = vpop.f32.mrf.mxu1 }
 0xd2f   : > { %vm2783_vm0 = vcmp.gt.f32.partialorder %v2779_v2, 0.0  ;;  %v2786_v6 = vmul.f32 %v2784_v0, %v2779_v2  ;;  %v2774_v7 = vadd.f32 %v3398_v61, %v2773_v4 }
 0xd31   : > { %v2788_v10 = vsel %vm2783_vm0, %v2779_v2, %v2786_v6  ;;  %vm2782_vm2 = vcmp.gt.f32.partialorder %v2774_v7, 0.0  ;;  %v2785_v12 = vmul.f32 %v2784_v0, %v2774_v7  ;;  %v3130_v0 = vld [vmem:[%s3960_s27] sm:$0xff] }
 0xd32   : > { %v2877_v15 = vadd.f32 %v2873_v9, %v2788_v10  ;;  %v3413_v6 = vld [vmem:[%s3965_s4] ss:$0 sm:$0xff] }
 0xd33   : > { %v2787_v16 = vsel %vm2782_vm2, %v2774_v7, %v2785_v12 }
 0xd34   : > { %vm2879_vm15 = vcmp.gt.f32.partialorder %v2877_v15, 0.0  ;;  %v2882_v18 = vmul.f32 %v2880_v11, %v2877_v15  ;;  %v2876_v19 = vadd.f32 %v2868_v14, %v2787_v16 }
 0xd36   : > { %v2881_v20 = vmul.f32 %v2880_v11, %v2876_v19  ;;  %vm2878_vm4 = vcmp.gt.f32.partialorder %v2876_v19, 0.0  ;;  %v4198_v21 = vsel %vm2879_vm15, %v2877_v15, %v2882_v18 }
 0xd37   : > { %v2891_v24 = vrot.slane %v4198_v21, 2 }
 0xd38   : > { %v2883_v22 = vsel %vm2878_vm4, %v2876_v19, %v2881_v20 }
 0xd39   : > { %v2890_v23 = vrot.slane %v2883_v22, 2 }
 0xd3b   : > { %2893 = vrot.lane.b32.xlu0 %v2890_v23, %s4300_s28  ;;  %v2892_v25 = vsel %vm1522_vm11, %v2890_v23, %v2891_v24 }
 0xd3c   : > { %2895 = vrot.lane.b32.xlu1 %v2892_v25, %s4300_s28 }
 0xd3f   : > { %2897 = vrot.lane.b32.xlu0 %v2891_v24, %s4300_s28  ;;  %s3404_s28 = sld [smem:[#allocation2 + $0xf]] }
 0xd45   : > { %v3005_v40 = vstv %s3404_s28 }
 0xdad   : > { %v2894_v26 = vpop.permute.xlu0 %2893 }
 0xdae   : > { %v2902_v27 = vsel %vm1211_vm3, 0.0, %v2894_v26  ;;  %v2896_v28 = vpop.permute.xlu1 %2895 }
 0xdaf   : > { %v2919_v29 = vrot.slane %v2902_v27, 6  ;;  %v2903_v30 = vsel %vm1211_vm3, %v2883_v22, %v2896_v28 }
 0xdb0   : > { %v2920_v31 = vrot.slane %v2903_v30, 6 }
 0xdb1   : > { %v2898_v32 = vpop.permute.xlu0 %2897 }
 0xdb2   : > { %v2904_v33 = vsel %vm1211_vm3, %v4198_v21, %v2898_v32  ;;  %v2921_v34 = vsel %vm1552_vm12, %v2919_v29, %v2920_v31 }
 0xdb3   : > { %v2922_v35 = vrot.slane %v2904_v33, 6  ;;  %3628 = vmatprep.mubr.msk.f32.mxu0 %vm1334_vm6, %v2921_v34 }
 0xdb5   : > { %v2923_v36 = vsel %vm1552_vm12, %v2920_v31, %v2922_v35 }
 0xdb6   : > { %3629 = vmatmul.mubr.msk.f32.vlgmr.msra.gmra.mxu0 %vm1334_vm6, %v2923_v36 }
 0xe76   : > { %v3630_v39 = vpop.f32.mrf.mxu0 }
 0xe77   : > { %v3000_v41 = vadd.f32 %v3630_v39, %v3407_v37 }
 0xe78   : > { %v2994_v42 = vpop.f32.mrf.mxu0 }
 0xe79   : > { %vm3004_vm5 = vcmp.gt.f32.partialorder %v3000_v41, 0.0  ;;  %v3007_v45 = vmul.f32 %v3005_v40, %v3000_v41  ;;  %v2995_v46 = vadd.f32 %v3407_v37, %v2994_v42 }
 0xe7b   : > { %v3009_v47 = vsel %vm3004_vm5, %v3000_v41, %v3007_v45  ;;  %vm3003_vm7 = vcmp.gt.f32.partialorder %v2995_v46, 0.0  ;;  %v3006_v48 = vmul.f32 %v3005_v40, %v2995_v46 }
 0xe7c   : > { %v3013_v50 = vrot.slane %v3009_v47, 2 }
 0xe7d   : > { %v3008_v49 = vsel %vm3003_vm7, %v2995_v46, %v3006_v48 }
 0xe7e   : > { %v3012_v51 = vrot.slane %v3008_v49, 2 }
 0xe80   : > { %3015 = vrot.lane.b32.xlu1 %v3012_v51, %s4297_s7  ;;  %v3014_v52 = vsel %vm1522_vm11, %v3012_v51, %v3013_v50 }
 0xe81   : > { %3017 = vrot.lane.b32.xlu0 %v3014_v52, %s4297_s7 }
 0xe84   : > { %3019 = vrot.lane.b32.xlu1 %v3013_v50, %s4297_s7  ;;  %s3405_s7 = sld [smem:[#allocation2 + $0x10]] }
 0xe8a   : > { %v3125_v3 = vstv %s3405_s7 }
 0xef2   : > { %v3016_v53 = vpop.permute.xlu1 %3015 }
 0xef3   : > { %v3024_v54 = vsel %vm1189_vm1, 0.0, %v3016_v53  ;;  %v3018_v55 = vpop.permute.xlu0 %3017 }
 0xef4   : > { %v3039_v56 = vrot.slane %v3024_v54, 6  ;;  %v3025_v57 = vsel %vm1189_vm1, %v3008_v49, %v3018_v55 }
 0xef5   : > { %v3040_v58 = vrot.slane %v3025_v57, 6 }
 0xef6   : > { %v3020_v59 = vpop.permute.xlu1 %3019 }
 0xef7   : > { %v3026_v60 = vsel %vm1189_vm1, %v3009_v47, %v3020_v59  ;;  %v3041_v61 = vsel %vm1552_vm12, %v3039_v56, %v3040_v58 }
 0xef8   : > { %v3042_v62 = vrot.slane %v3026_v60, 6  ;;  %3635 = vmatprep.mubr.msk.f32.mxu1 %vm1211_vm3, %v3041_v61 }
 0xefa   : > { %v3043_v63 = vsel %vm1552_vm12, %v3040_v58, %v3042_v62 }
 0xefb   : > { %3636 = vmatmul.mubr.msk.f32.vlgmr.msra.gmra.mxu1 %vm1211_vm3, %v3043_v63 }
 0xefc   : > { %3639 = vmatpush3.msra.mxu1 %v3131_v44  ;;  %3642 = vmatprep.mubr.msk.f32.mxu1 %vm1211_vm3, %v2883_v22 }
 0xefd   : > { %3640 = vmatprep.subr.mxu1 %v3130_v0 }
 0xefe   : > { %3641 = vmatpush3.msra.mxu1 %v3130_v0 }
 0xeff   : > { %3643 = vmatmul.mubr.msk.f32.vlgmr.msra.gmra.mxu1 %vm1211_vm3, %v4198_v21 }
 0xfbb   : > { %v3637_v2 = vpop.f32.mrf.mxu1 }
 0xfbc   : > { %v3120_v4 = vadd.f32 %v3637_v2, %v3410_v1 }
 0xfbd   : > { %v3114_v5 = vpop.f32.mrf.mxu1 }
 0xfbe   : > { %vm3124_vm6 = vcmp.gt.f32.partialorder %v3120_v4, 0.0  ;;  %v3127_v7 = vmul.f32 %v3125_v3, %v3120_v4  ;;  %v3115_v8 = vadd.f32 %v3410_v1, %v3114_v5 }
 0xfbf   : > { %v3644_v9 = vpop.f32.mrf.mxu1 }
 0xfc0   : > { %vm3123_vm11 = vcmp.gt.f32.partialorder %v3115_v8, 0.0  ;;  %v3126_v10 = vmul.f32 %v3125_v3, %v3115_v8  ;;  %v3129_v11 = vsel %vm3124_vm6, %v3120_v4, %v3127_v7  ;;  %v3215_v12 = vadd.f32 %v3644_v9, %v3413_v6 }
 0xfc1   : > { %v3209_v14 = vpop.f32.mrf.mxu1 }
 0xfc2   : > { %v3219_v15 = vadd.f32 %v3215_v12, %v3129_v11  ;;  %v3128_v16 = vsel %vm3123_vm11, %v3115_v8, %v3126_v10  ;;  %v3210_v17 = vadd.f32 %v3413_v6, %v3209_v14 }
 0xfc4   : > { %vm3221_vm3 = vcmp.gt.f32.partialorder %v3219_v15, 0.0  ;;  %v3224_v18 = vmul.f32 %v3222_v13, %v3219_v15  ;;  %v3218_v19 = vadd.f32 %v3210_v17, %v3128_v16 }
 0xfc6   : > { %v3226_v20 = vsel %vm3221_vm3, %v3219_v15, %v3224_v18  ;;  %vm3220_vm12 = vcmp.gt.f32.partialorder %v3218_v19, 0.0  ;;  %v3223_v21 = vmul.f32 %v3222_v13, %v3218_v19 }
 0xfc7   : > { %3228 = vst.msk [vmem:[%s1168_s3 + $0x8] sm:$0xff] %vm1189_vm1, %v3226_v20 }
 0xfc8   : > { %v3225_v22 = vsel %vm3220_vm12, %v3218_v19, %v3223_v21 }
 0xfc9   : > { %3227 = vst.msk [vmem:[%s1168_s3] sm:$0xff] %vm1189_vm1, %v3225_v22 }
 0xfca PF: > { %s88_s15 = sadd.s32 1, %s3729_s15  }
 0xfcb   : > { %p85_p1 = scmp.ge.s32.totalorder %s88_s15, 4  }
 0xfcd   :  { %87 = sbr.rel (!%p85_p1) target bundleno = 75 (0x4b), region = 245 }
 0xfd2   :  { %3250 = vsyncpa [#allocation3], 1 }
 0xfd3   :  { %3252 = vsyncpa [#allocation3 + $0x1], 1 }

</bundles_post_ra>
